<compile_context>
chip_gen: v7x
topology: tpu7x:2x2x1
jax: 0.10.0
libtpu: 0.0.40
codegen_flags: <defaults>
</compile_context>

<pallas_src>
import jax
import jax.numpy as jnp
from jax.experimental import pallas as pl
from jax.experimental.pallas import tpu as pltpu

IN_F, H1, H2, OUT_F = 2500, 500, 100, 1


def _round_up(n, m):
    return ((n + m - 1) // m) * m


def encoder_mlp_kernel(x_ref, w1_ref, b1_ref, w2_ref, b2_ref, w3_ref, b3_ref,
                       o_ref):
    # MXU matmuls with bf16 operands and f32 accumulation; bias+ReLU in f32.
    x = x_ref[...].astype(jnp.bfloat16)                      # (TM, 2500)
    h1 = jnp.dot(x, w1_ref[...], preferred_element_type=jnp.float32)
    h1 = jnp.maximum(h1 + b1_ref[...], 0.0)                  # (TM, 500) f32

    h2 = jnp.dot(h1.astype(jnp.bfloat16), w2_ref[...],
                 preferred_element_type=jnp.float32)
    h2 = jnp.maximum(h2 + b2_ref[...], 0.0)                  # (TM, 100) f32

    # Final (100 -> 1) layer on VPU (mul) + XLU (lane reduce) instead of a
    # near-empty 1-output-lane MXU pass; b3 is a scalar read from SMEM.
    out = jnp.sum(h2 * w3_ref[...], axis=-1, keepdims=True) + b3_ref[0, 0]
    o_ref[...] = out.astype(o_ref.dtype)                     # (TM, 1)


def encoder_mlp_forward(x_flat, params, *, tm=256):
    """x_flat: (B, 2500) f32. params: dict of w1,b1,w2,b2,w3,b3."""
    B = x_flat.shape[0]
    w1, b1 = params["w1"], params["b1"]
    w2, b2 = params["w2"], params["b2"]
    w3, b3 = params["w3"], params["b3"]

    # Batch tile: don't over-allocate for tiny batches; keep multiple of 8.
    tm = min(tm, _round_up(B, 8))
    grid = (pl.cdiv(B, tm),)

    # VMEM budget from the actual footprint (portable to v7x's 64 MiB VMEM):
    # resident bf16 weights + double-buffered x/out tiles + activation slack.
    weight_bytes = IN_F * H1 * 2 + H1 * H2 * 2 + (H1 + 2 * H2 + 1) * 4
    x_tile_bytes = tm * IN_F * 4
    act_bytes = tm * (H1 + H2) * 4
    vmem_limit = int(min(
        max(weight_bytes + 2 * x_tile_bytes + 4 * act_bytes + (4 << 20),
            16 << 20),
        48 << 20))

    cost = pl.CostEstimate(
        flops=2 * B * (IN_F * H1 + H1 * H2 + H2),
        transcendentals=0,
        bytes_accessed=B * IN_F * 4 + B * OUT_F * 4 + weight_bytes,
    )

    const2d = lambda shape: pl.BlockSpec(shape, lambda i: (0, 0))

    return pl.pallas_call(
        encoder_mlp_kernel,
        out_shape=jax.ShapeDtypeStruct((B, OUT_F), x_flat.dtype),
        grid=grid,
        in_specs=[
            pl.BlockSpec((tm, IN_F), lambda i: (i, 0)),   # x: pipelined tiles
            const2d((IN_F, H1)),                          # w1 (bf16, resident)
            const2d((1, H1)),                             # b1
            const2d((H1, H2)),                            # w2 (bf16, resident)
            const2d((1, H2)),                             # b2
            const2d((1, H2)),                             # w3 as a (1,100) row
            pl.BlockSpec(memory_space=pltpu.MemorySpace.SMEM),  # b3 scalar
        ],
        out_specs=pl.BlockSpec((tm, OUT_F), lambda i: (i, 0)),
        compiler_params=pltpu.CompilerParams(
            dimension_semantics=("parallel",),
            vmem_limit_bytes=vmem_limit,
        ),
        cost_estimate=cost,
    )(x_flat, w1, b1, w2, b2, w3, b3)


def init_params(key):
    """Deterministic synthetic init; nn.Linear-style uniform(-1/sqrt(fan_in), +).

    Weights of the two big layers are stored transposed (in, out) and in
    bfloat16 (halves weight DMA; matmuls accumulate in f32). w3 is kept as an
    f32 (1, 100) row used by the VPU final layer; b3 is a (1, 1) f32 scalar.
    """
    ks = jax.random.split(key, 6)

    def linear(kw, kb, fan_in, fan_out, w_dtype):
        bound = 1.0 / jnp.sqrt(jnp.float32(fan_in))
        w = jax.random.uniform(kw, (fan_in, fan_out), jnp.float32, -bound,
                               bound).astype(w_dtype)
        b = jax.random.uniform(kb, (1, fan_out), jnp.float32, -bound, bound)
        return w, b

    w1, b1 = linear(ks[0], ks[1], IN_F, H1, jnp.bfloat16)
    w2, b2 = linear(ks[2], ks[3], H1, H2, jnp.bfloat16)
    w3_col, b3 = linear(ks[4], ks[5], H2, OUT_F, jnp.float32)
    w3 = w3_col.reshape(1, H2)          # (1, 100) row for broadcast-mul
    b3 = b3.reshape(1, 1)               # (1, 1) scalar, lives in SMEM
    return dict(w1=w1, b1=b1, w2=w2, b2=b2, w3=w3, b3=b3)


def reference_forward(x_flat, p):
    """Pure-JAX reference mirroring the kernel's bf16-operand / f32-accum math."""
    h1 = jnp.dot(x_flat.astype(jnp.bfloat16), p["w1"],
                 preferred_element_type=jnp.float32)
    h1 = jnp.maximum(h1 + p["b1"], 0.0)
    h2 = jnp.dot(h1.astype(jnp.bfloat16), p["w2"],
                 preferred_element_type=jnp.float32)
    h2 = jnp.maximum(h2 + p["b2"], 0.0)
    return jnp.sum(h2 * p["w3"], axis=-1, keepdims=True) + p["b3"][0, 0]


if __name__ == "__main__":
    key = jax.random.PRNGKey(0)
    kx, kp = jax.random.split(key)

    # Input consistent with the 2500-feature flatten: NCHW (B=2, C=1, 50, 50).
    x = jax.random.normal(kx, (2, 1, 50, 50), jnp.float32)
    params = init_params(kp)

    x_flat = x.reshape(x.shape[0], -1)  # (2, 2500), same as torch .view

    out = encoder_mlp_forward(x_flat, params)
    out = jax.block_until_ready(out)

    ref = reference_forward(x_flat, params)
    assert out.shape == (2, 1)
    assert jnp.allclose(out, ref, atol=1e-3, rtol=1e-3), (
        f"max abs err {jnp.max(jnp.abs(out - ref))}")

    print("KERNEL_OK")
</pallas_src>

<mosaic_0001>
module attributes {stable_mosaic.version = 11 : i64} {
  func.func @encoder_mlp_kernel(%arg0: i32, %arg1: memref<8x2500xf32, #tpu.memory_space<vmem>>, %arg2: memref<2500x500xbf16, #tpu.memory_space<vmem>>, %arg3: memref<1x500xf32, #tpu.memory_space<vmem>>, %arg4: memref<500x100xbf16, #tpu.memory_space<vmem>>, %arg5: memref<1x100xf32, #tpu.memory_space<vmem>>, %arg6: memref<1x100xf32, #tpu.memory_space<vmem>>, %arg7: memref<1x1xf32, #tpu.memory_space<smem>>, %arg8: memref<8x1xf32, #tpu.memory_space<vmem>>) attributes {dimension_semantics = [#tpu.dimension_semantics<parallel>], iteration_bounds = array<i64: 1>, scalar_prefetch = 0 : i64, scratch_operands = 0 : i64, tpu.core_type = #tpu.core_type<tc>, window_params = [{transform_indices = @transform_0, window_bounds = array<i64: 8, 2500>}, {pipeline_mode = #tpu.pipeline_mode<synchronous>, transform_indices = @transform_1, window_bounds = array<i64: 2500, 500>}, {pipeline_mode = #tpu.pipeline_mode<synchronous>, transform_indices = @transform_2, window_bounds = array<i64: 1, 500>}, {pipeline_mode = #tpu.pipeline_mode<synchronous>, transform_indices = @transform_3, window_bounds = array<i64: 500, 100>}, {pipeline_mode = #tpu.pipeline_mode<synchronous>, transform_indices = @transform_4, window_bounds = array<i64: 1, 100>}, {pipeline_mode = #tpu.pipeline_mode<synchronous>, transform_indices = @transform_5, window_bounds = array<i64: 1, 100>}, {transform_indices = @transform_6, window_bounds = array<i64: 1, 1>}, {transform_indices = @transform_7, window_bounds = array<i64: 8, 1>}]} {
    %c0 = arith.constant 0 : index
    %c0_0 = arith.constant 0 : index
    %0 = vector.load %arg1[%c0, %c0_0] : memref<8x2500xf32, #tpu.memory_space<vmem>>, vector<8x2500xf32>
    %1 = arith.truncf %0 : vector<8x2500xf32> to vector<8x2500xbf16>
    %c0_1 = arith.constant 0 : index
    %c0_2 = arith.constant 0 : index
    %2 = vector.load %arg2[%c0_1, %c0_2] : memref<2500x500xbf16, #tpu.memory_space<vmem>>, vector<2500x500xbf16>
    %cst = arith.constant dense<0.000000e+00> : vector<8x500xf32>
    %3 = tpu.matmul %1, %2, %cst {dimension_numbers = #tpu.dot_dimension_numbers<[1], [0], [0], [1], [0, 0, 1, 1], [], []>} : vector<8x2500xbf16>, vector<2500x500xbf16>, vector<8x500xf32> -> vector<8x500xf32>
    %c0_3 = arith.constant 0 : index
    %c0_4 = arith.constant 0 : index
    %4 = vector.load %arg3[%c0_3, %c0_4] : memref<1x500xf32, #tpu.memory_space<vmem>>, vector<1x500xf32>
    %5 = vector.broadcast %4 : vector<1x500xf32> to vector<8x500xf32>
    %6 = arith.addf %3, %5 : vector<8x500xf32>
    %cst_5 = arith.constant 0.000000e+00 : f32
    %7 = vector.broadcast %cst_5 : f32 to vector<8x500xf32>
    %8 = arith.maximumf %6, %7 : vector<8x500xf32>
    %9 = arith.truncf %8 : vector<8x500xf32> to vector<8x500xbf16>
    %c0_6 = arith.constant 0 : index
    %c0_7 = arith.constant 0 : index
    %10 = vector.load %arg4[%c0_6, %c0_7] : memref<500x100xbf16, #tpu.memory_space<vmem>>, vector<500x100xbf16>
    %cst_8 = arith.constant dense<0.000000e+00> : vector<8x100xf32>
    %11 = tpu.matmul %9, %10, %cst_8 {dimension_numbers = #tpu.dot_dimension_numbers<[1], [0], [0], [1], [0, 0, 1, 1], [], []>} : vector<8x500xbf16>, vector<500x100xbf16>, vector<8x100xf32> -> vector<8x100xf32>
    %c0_9 = arith.constant 0 : index
    %c0_10 = arith.constant 0 : index
    %12 = vector.load %arg5[%c0_9, %c0_10] : memref<1x100xf32, #tpu.memory_space<vmem>>, vector<1x100xf32>
    %13 = vector.broadcast %12 : vector<1x100xf32> to vector<8x100xf32>
    %14 = arith.addf %11, %13 : vector<8x100xf32>
    %cst_11 = arith.constant 0.000000e+00 : f32
    %15 = vector.broadcast %cst_11 : f32 to vector<8x100xf32>
    %16 = arith.maximumf %14, %15 : vector<8x100xf32>
    %c0_12 = arith.constant 0 : index
    %c0_13 = arith.constant 0 : index
    %17 = vector.load %arg6[%c0_12, %c0_13] : memref<1x100xf32, #tpu.memory_space<vmem>>, vector<1x100xf32>
    %18 = vector.broadcast %17 : vector<1x100xf32> to vector<8x100xf32>
    %19 = arith.mulf %16, %18 : vector<8x100xf32>
    %cst_14 = arith.constant dense<0.000000e+00> : vector<8xf32>
    %20 = vector.multi_reduction <add>, %19, %cst_14 [1] : vector<8x100xf32> to vector<8xf32>
    %21 = vector.shape_cast %20 : vector<8xf32> to vector<8x1xf32>
    %c0_15 = arith.constant 0 : index
    %c0_16 = arith.constant 0 : index
    %22 = memref.load %arg7[%c0_15, %c0_16] : memref<1x1xf32, #tpu.memory_space<smem>>
    %23 = vector.broadcast %22 : f32 to vector<8x1xf32>
    %24 = arith.addf %21, %23 : vector<8x1xf32>
    %c0_17 = arith.constant 0 : index
    %c0_18 = arith.constant 0 : index
    %25 = vector.load %arg8[%c0_17, %c0_18] : memref<8x1xf32, #tpu.memory_space<vmem>>, vector<8x1xf32>
    tpu.vector_store %arg8[%c0_17, %c0_18], %24 {strides = array<i32>} : memref<8x1xf32, #tpu.memory_space<vmem>>, vector<8x1xf32>,
    return
  }
  func.func @transform_0(%arg0: i32) -> (i32, i32) {
    %c0_i32 = arith.constant 0 : i32
    %c0_i32_0 = arith.constant 0 : i32
    return %arg0, %c0_i32 : i32, i32
  }
  func.func @transform_1(%arg0: i32) -> (i32, i32) {
    %c0_i32 = arith.constant 0 : i32
    %c0_i32_0 = arith.constant 0 : i32
    %c0_i32_1 = arith.constant 0 : i32
    return %c0_i32, %c0_i32_0 : i32, i32
  }
  func.func @transform_2(%arg0: i32) -> (i32, i32) {
    %c0_i32 = arith.constant 0 : i32
    %c0_i32_0 = arith.constant 0 : i32
    %c0_i32_1 = arith.constant 0 : i32
    return %c0_i32, %c0_i32_0 : i32, i32
  }
  func.func @transform_3(%arg0: i32) -> (i32, i32) {
    %c0_i32 = arith.constant 0 : i32
    %c0_i32_0 = arith.constant 0 : i32
    %c0_i32_1 = arith.constant 0 : i32
    return %c0_i32, %c0_i32_0 : i32, i32
  }
  func.func @transform_4(%arg0: i32) -> (i32, i32) {
    %c0_i32 = arith.constant 0 : i32
    %c0_i32_0 = arith.constant 0 : i32
    %c0_i32_1 = arith.constant 0 : i32
    return %c0_i32, %c0_i32_0 : i32, i32
  }
  func.func @transform_5(%arg0: i32) -> (i32, i32) {
    %c0_i32 = arith.constant 0 : i32
    %c0_i32_0 = arith.constant 0 : i32
    %c0_i32_1 = arith.constant 0 : i32
    return %c0_i32, %c0_i32_0 : i32, i32
  }
  func.func @transform_6(%arg0: i32) -> (i32, i32) {
    %c0_i32 = arith.constant 0 : i32
    %c0_i32_0 = arith.constant 0 : i32
    %c0_i32_1 = arith.constant 0 : i32
    return %c0_i32, %c0_i32_0 : i32, i32
  }
  func.func @transform_7(%arg0: i32) -> (i32, i32) {
    %c0_i32 = arith.constant 0 : i32
    %c0_i32_0 = arith.constant 0 : i32
    return %arg0, %c0_i32 : i32, i32
  }
}

</mosaic_0001>

<bundles_post_ra>
// kernel: tpu_custom_call.1
= control target key start
LH: loop header
LB: loop body
LE: loop exit
PB: predicated region body
PF: predicated region fallthrough
CT: control target
= control target key end

     0   :  { %13 = vsyncpa [#allocation4], 0  ;;  %s7613_s0 = inlined_call_operand.hbm [shape: f32[2,2500], index: 0, kind: input, shape index: {}]   ;;  %s7614_s1 = inlined_call_operand.hbm [shape: bf16[2500,500], index: 1, kind: input, shape index: {}]   ;;  %s7615_s2 = inlined_call_operand.hbm [shape: f32[1,500], index: 2, kind: input, shape index: {}]   ;;  %s7616_s3 = inlined_call_operand.vmem [shape: bf16[500,100], index: 3, kind: input, shape index: {}]   ;;  %s7617_s4 = inlined_call_operand.hbm [shape: f32[1,100], index: 4, kind: input, shape index: {}]   ;;  %s7618_s5 = inlined_call_operand.hbm [shape: f32[1,100], index: 5, kind: input, shape index: {}]   ;;  %s7619_s6 = inlined_call_operand.<no memory space> [shape: f32[1,1], index: 6, kind: input, shape index: {}]   ;;  %s7620_s7 = inlined_call_operand.vmem [shape: f32[2,1], index: 7, kind: output, shape index: {}]  }
   0x1   :  { %14 = vsyncpa [#allocation6], 0 }
   0x2   :  { %15 = vsyncpa [#allocation9], 0 }
   0x3   :  { %20 = vsyncadd [#allocation4], 1920  ;;  %s7295_s24 = smov [#allocation5]   ;;  %s7179_s28 = scalar_lea.hbm %s7614_s1, 80128 }
   0x4   :  { %s33_s25 = sshll.u32 %s7295_s24, 4  ;;  %p7180_p0 = scmp.ne.s32.totalorder %s7614_s1, %s7179_s28  ;;  %s34_s25 = int_to_ptr.vmem [resolvable:$true] %s33_s25 }
   0x5   :  { %p7183_p1 = scmp.lt.u32.totalorder %s7179_s28, %s7614_s1 }
   0x7   :  { %p7185_p2 = pnand %p7183_p1, %p7180_p0 }
   0x9   :  { %7188 = shalt.err (!%p7185_p2)
}
   0xa   :  { %s7189_s10 = scalar_lea.vmem %s34_s25, 80128  ;;  %p7194_p4 = scmp.lt.s32.totalorder %s34_s25, %s34_s25 }
   0xb   :  { %p7190_p3 = scmp.ne.s32.totalorder %s34_s25, %s7189_s10  ;;  %p7195_p5 = scmp.lt.s32.totalorder %s7189_s10, %s7189_s10 }
   0xd   :  { %p7196_p6 = por %p7195_p5, %p7194_p4 }
   0xf   :  { %p7197_p7 = pnand %p7196_p6, %p7190_p3 }
  0x11   :  { %7200 = shalt.err (!%p7197_p7)
}
  0x12   :  { %s7296_s11 = smov 256   ;;  %s7297_s12 = smov 16  }
  0x13   :  { %39 = dma.hbm_to_vmem [thread:$0]  %s7614_s1, 80128, %s34_s25, [#allocation6], %s7296_s11, %s7296_s11, %s7297_s12  }
  0x14   :  { %s7298_s15 = smov [#allocation8]   ;;  %s7299_s17 = smov [#allocation3]  }
  0x15   :  { %s58_s16 = sshll.u32 %s7298_s15, 4  ;;  %s21_s18 = sshll.u32 %s7299_s17, 4  ;;  %s59_s16 = int_to_ptr.vmem [resolvable:$true] %s58_s16  ;;  %s22_s18 = int_to_ptr.vmem [resolvable:$true] %s21_s18 }
  0x16   :  { %s7201_s21 = scalar_lea.hbm %s7617_s4, 16 }
  0x17   :  { %p7202_p8 = scmp.ne.s32.totalorder %s7617_s4, %s7201_s21  ;;  %p7205_p9 = scmp.lt.u32.totalorder %s7201_s21, %s7617_s4 }
  0x19   :  { %p7207_p10 = pnand %p7205_p9, %p7202_p8 }
  0x1b   :  { %7210 = shalt.err (!%p7207_p10)
}
  0x1c   :  { %s7211_s1 = scalar_lea.vmem %s59_s16, 16  ;;  %s7215_s25 = scalar_lea.vmem %s59_s16, 32 }
  0x1d   :  { %p7212_p11 = scmp.ne.s32.totalorder %s59_s16, %s7211_s1  ;;  %p7216_p12 = scmp.lt.s32.totalorder %s59_s16, %s59_s16 }
  0x1e   :  { %p7217_p13 = scmp.lt.s32.totalorder %s7215_s25, %s7211_s1 }
  0x20   :  { %p7218_p0 = por %p7217_p13, %p7216_p12 }
  0x22   :  { %p7219_p1 = pnand %p7218_p0, %p7212_p11 }
  0x24   :  { %7222 = shalt.err (!%p7219_p1)
}
  0x25   :  { %61 = dma.hbm_to_vmem [thread:$0]  %s7617_s4, 16, %s59_s16, [#allocation9]  }
  0x26   :  { %s7223_s8 = scalar_lea.hbm %s7613_s0, 640 }
  0x27   :  { %p7224_p2 = scmp.ne.s32.totalorder %s7613_s0, %s7223_s8  ;;  %p7227_p3 = scmp.lt.u32.totalorder %s7223_s8, %s7613_s0 }
  0x29   :  { %p7229_p4 = pnand %p7227_p3, %p7224_p2 }
  0x2b   :  { %7232 = shalt.err (!%p7229_p4)
}
  0x2c   :  { %s7233_s13 = scalar_lea.vmem %s22_s18, 640  ;;  %s7237_s14 = scalar_lea.vmem %s22_s18, 2560 }
  0x2d   :  { %p7234_p5 = scmp.ne.s32.totalorder %s22_s18, %s7233_s13  ;;  %p7238_p6 = scmp.lt.s32.totalorder %s22_s18, %s22_s18 }
  0x2e   :  { %p7239_p7 = scmp.lt.s32.totalorder %s7237_s14, %s7233_s13 }
  0x30   :  { %p7240_p8 = por %p7239_p7, %p7238_p6 }
  0x32   :  { %p7241_p9 = pnand %p7240_p8, %p7234_p5 }
  0x34   :  { %7244 = shalt.err (!%p7241_p9)
}
  0x35   :  { %s7300_s4 = smov 640   ;;  %s7301_s15 = smov 40  }
  0x36   :  { %27 = dma.hbm_to_vmem [thread:$0]  %s7613_s0, 640, %s22_s18, [#allocation4], %s7300_s4, %s7300_s4, %s7301_s15  }
  0x37   :  { %s7302_s19 = smov [#allocation7]   ;;  %s7303_s21 = smov [#allocation10]  }
  0x38   :  { %s46_s20 = sshll.u32 %s7302_s19, 4  ;;  %s68_s22 = sshll.u32 %s7303_s21, 4  ;;  %s47_s20 = int_to_ptr.vmem [resolvable:$true] %s46_s20  ;;  %s69_s22 = int_to_ptr.vmem [resolvable:$true] %s68_s22 }
  0x39   :  { %s7245_s26 = scalar_lea.hbm %s7615_s2, 64 }
  0x3a   :  { %p7246_p10 = scmp.ne.s32.totalorder %s7615_s2, %s7245_s26  ;;  %p7249_p11 = scmp.lt.u32.totalorder %s7245_s26, %s7615_s2 }
  0x3c   :  { %p7251_p12 = pnand %p7249_p11, %p7246_p10 }
  0x3e   :  { %7254 = shalt.err (!%p7251_p12)
}
  0x3f   :  { %s7255_s0 = scalar_lea.vmem %s47_s20, 64  ;;  %p7260_p0 = scmp.lt.s32.totalorder %s47_s20, %s47_s20 }
  0x40   :  { %p7256_p13 = scmp.ne.s32.totalorder %s47_s20, %s7255_s0  ;;  %p7261_p1 = scmp.lt.s32.totalorder %s7255_s0, %s7255_s0 }
  0x42   :  { %p7262_p2 = por %p7261_p1, %p7260_p0 }
  0x44   :  { %p7263_p3 = pnand %p7262_p2, %p7256_p13 }
  0x46   :  { %7266 = shalt.err (!%p7263_p3)
}
  0x47   :  { %49 = dma.hbm_to_vmem [thread:$0]  %s7615_s2, 64, %s47_s20, [#allocation6]  }
  0x48   :  { %s7267_s9 = scalar_lea.hbm %s7618_s5, 16 }
  0x49   :  { %p7268_p4 = scmp.ne.s32.totalorder %s7618_s5, %s7267_s9  ;;  %p7271_p5 = scmp.lt.u32.totalorder %s7267_s9, %s7618_s5 }
  0x4b   :  { %p7273_p6 = pnand %p7271_p5, %p7268_p4 }
  0x4d   :  { %7276 = shalt.err (!%p7273_p6)
}
  0x4e   :  { %s7277_s14 = scalar_lea.vmem %s69_s22, 16  ;;  %s7281_s4 = scalar_lea.vmem %s69_s22, 32 }
  0x4f   :  { %p7278_p7 = scmp.ne.s32.totalorder %s69_s22, %s7277_s14  ;;  %p7282_p8 = scmp.lt.s32.totalorder %s69_s22, %s69_s22 }
  0x50   :  { %p7283_p9 = scmp.lt.s32.totalorder %s7281_s4, %s7277_s14 }
  0x52   :  { %p7284_p10 = por %p7283_p9, %p7282_p8 }
  0x54   :  { %p7285_p11 = pnand %p7284_p10, %p7278_p7 }
  0x56   :  { %7288 = shalt.err (!%p7285_p11)
}
  0x57   :  { %71 = dma.hbm_to_vmem [thread:$0]  %s7618_s5, 16, %s69_s22, [#allocation9]  }
  0x58   :  { %7289 = dma.done.wait [#allocation4], 2560  }
  0x59   :  { %7290 = vsyncadd [#allocation4], 4294964736 }
  0x5a   :  { %7291 = dma.done.wait [#allocation6], 80192  }
  0x5b   :  { %7292 = vsyncadd [#allocation6], 4294887104 }
  0x5c   :  { %7293 = dma.done.wait [#allocation9], 32  }
  0x5d   :  { %7294 = vsyncadd [#allocation9], 4294967264  ;;  %v6177_v0 = vld [vmem:[#allocation5 + $0x4] ss:$16 sps:$4 sm:$0xff]   ;;  %v6179_v1 = vld [vmem:[#allocation5 + $0xc] ss:$16 sps:$4 sm:$0xff]   ;;  %v137_v40 = vlaneseq }
  0x5e   :  { %4145 = vmatprep.subr.bf16.mxu0 %v6177_v0  ;;  %v6181_v2 = vld [vmem:[#allocation5] ss:$16 sps:$4 sm:$0xff]   ;;  %v6182_v3 = vld [vmem:[#allocation5 + $0x8] ss:$16 sps:$4 sm:$0xff]   ;;  %4555 = vmatprep.subr.bf16.mxu1 %v6179_v1  ;;  %v6183_v4 = vld [vmem:[#allocation5 + $0x24] ss:$16 sps:$4 sm:$0xff]  }
  0x5f   :  { %4146 = vmatpush1.bf16.msra.mxu0 %v6181_v2  ;;  %4556 = vmatpush1.bf16.msra.mxu1 %v6182_v3  ;;  %v6185_v5 = vld [vmem:[#allocation5 + $0x2c] ss:$16 sps:$4 sm:$0xff]   ;;  %v6187_v6 = vld [vmem:[#allocation5 + $0x20] ss:$16 sps:$4 sm:$0xff]   ;;  %v6188_v7 = vld [vmem:[#allocation5 + $0x28] ss:$16 sps:$4 sm:$0xff]  }
  0x60   :  { %4147 = vmatprep.subr.bf16.mxu0 %v6183_v4  ;;  %4557 = vmatprep.subr.bf16.mxu1 %v6185_v5  ;;  %v6189_v8 = vld [vmem:[#allocation5 + $0x44] ss:$16 sps:$4 sm:$0xff]   ;;  %v6191_v9 = vld [vmem:[#allocation5 + $0x4c] ss:$16 sps:$4 sm:$0xff]   ;;  %v6193_v10 = vld [vmem:[#allocation5 + $0x40] ss:$16 sps:$4 sm:$0xff]  }
  0x61   :  { %v6194_v11 = vld [vmem:[#allocation5 + $0x48] ss:$16 sps:$4 sm:$0xff]   ;;  %v6195_v12 = vld [vmem:[#allocation5 + $0x64] ss:$16 sps:$4 sm:$0xff]   ;;  %v6197_v13 = vld [vmem:[#allocation5 + $0x6c] ss:$16 sps:$4 sm:$0xff]  }
  0x62   :  { %v6199_v14 = vld [vmem:[#allocation5 + $0x60] ss:$16 sps:$4 sm:$0xff]   ;;  %v6200_v15 = vld [vmem:[#allocation5 + $0x68] ss:$16 sps:$4 sm:$0xff]   ;;  %v6201_v16 = vld [vmem:[#allocation5 + $0x84] ss:$16 sps:$4 sm:$0xff]  }
  0x63   :  { %4148 = vmatpush1.bf16.msra.mxu0 %v6187_v6  ;;  %4558 = vmatpush1.bf16.msra.mxu1 %v6188_v7  ;;  %v6203_v17 = vld [vmem:[#allocation5 + $0x8c] ss:$16 sps:$4 sm:$0xff]   ;;  %v6205_v18 = vld [vmem:[#allocation5 + $0x80] ss:$16 sps:$4 sm:$0xff]   ;;  %v6206_v19 = vld [vmem:[#allocation5 + $0x88] ss:$16 sps:$4 sm:$0xff]  }
  0x64   :  { %4149 = vmatprep.subr.bf16.mxu0 %v6189_v8  ;;  %4559 = vmatprep.subr.bf16.mxu1 %v6191_v9  ;;  %v6207_v20 = vld [vmem:[#allocation5 + $0xa4] ss:$16 sps:$4 sm:$0xff]   ;;  %v6209_v21 = vld [vmem:[#allocation5 + $0xac] ss:$16 sps:$4 sm:$0xff]   ;;  %v6211_v22 = vld [vmem:[#allocation5 + $0xa0] ss:$16 sps:$4 sm:$0xff]  }
  0x65   :  { %v6212_v23 = vld [vmem:[#allocation5 + $0xa8] ss:$16 sps:$4 sm:$0xff]   ;;  %v6213_v24 = vld [vmem:[#allocation5 + $0xc4] ss:$16 sps:$4 sm:$0xff]   ;;  %v6215_v25 = vld [vmem:[#allocation5 + $0xcc] ss:$16 sps:$4 sm:$0xff]  }
  0x66   :  { %v6217_v26 = vld [vmem:[#allocation5 + $0xc0] ss:$16 sps:$4 sm:$0xff]   ;;  %v6218_v27 = vld [vmem:[#allocation5 + $0xc8] ss:$16 sps:$4 sm:$0xff]   ;;  %v6219_v28 = vld [vmem:[#allocation5 + $0xe4] ss:$16 sps:$4 sm:$0xff]  }
  0x67   :  { %4150 = vmatpush1.bf16.msra.mxu0 %v6193_v10  ;;  %4560 = vmatpush1.bf16.msra.mxu1 %v6194_v11  ;;  %v6221_v29 = vld [vmem:[#allocation5 + $0xec] ss:$16 sps:$4 sm:$0xff]   ;;  %v6223_v30 = vld [vmem:[#allocation5 + $0xe0] ss:$16 sps:$4 sm:$0xff]   ;;  %v6224_v31 = vld [vmem:[#allocation5 + $0xe8] ss:$16 sps:$4 sm:$0xff]  }
  0x68   :  { %4151 = vmatprep.subr.bf16.mxu0 %v6195_v12  ;;  %4561 = vmatprep.subr.bf16.mxu1 %v6197_v13  ;;  %v6225_v32 = vld [vmem:[#allocation5 + $0x104] ss:$16 sps:$4 sm:$0xff]   ;;  %v6227_v33 = vld [vmem:[#allocation5 + $0x10c] ss:$16 sps:$4 sm:$0xff]   ;;  %v6229_v34 = vld [vmem:[#allocation5 + $0x100] ss:$16 sps:$4 sm:$0xff]  }
  0x69   :  { %v6230_v35 = vld [vmem:[#allocation5 + $0x108] ss:$16 sps:$4 sm:$0xff]   ;;  %v6231_v36 = vld [vmem:[#allocation5 + $0x124] ss:$16 sps:$4 sm:$0xff]   ;;  %v6233_v37 = vld [vmem:[#allocation5 + $0x12c] ss:$16 sps:$4 sm:$0xff]  }
  0x6a   :  { %v7304_v38 = vmov 1983009808   ;;  %v6235_v41 = vld [vmem:[#allocation5 + $0x120] ss:$16 sps:$4 sm:$0xff]   ;;  %v6236_v42 = vld [vmem:[#allocation5 + $0x128] ss:$16 sps:$4 sm:$0xff]  }
  0x6b   :  { %4152 = vmatpush1.bf16.msra.mxu0 %v6199_v14  ;;  %4562 = vmatpush1.bf16.msra.mxu1 %v6200_v15  ;;  %v135_v39 = vunpack.c.l.s4 %v7304_v38  ;;  %v6237_v43 = vld [vmem:[#allocation5 + $0x144] ss:$16 sps:$4 sm:$0xff]   ;;  %v6239_v44 = vld [vmem:[#allocation5 + $0x14c] ss:$16 sps:$4 sm:$0xff]   ;;  %v7405_v46 = vshrl.u32 %v137_v40, 7  ;;  %vm4128_vm0 = vcmask 556032  }
  0x6c   :  { %4153 = vmatprep.subr.bf16.mxu0 %v6201_v16  ;;  %4563 = vmatprep.subr.bf16.mxu1 %v6203_v17  ;;  %v6241_v47 = vld [vmem:[#allocation5 + $0x140] ss:$16 sps:$4 sm:$0xff]   ;;  %v6242_v48 = vld [vmem:[#allocation5 + $0x148] ss:$16 sps:$4 sm:$0xff]   ;;  %v6243_v49 = vld [vmem:[#allocation5 + $0x164] ss:$16 sps:$4 sm:$0xff]  }
  0x6d   :  { %v136_v45 = vunpack.c.0.s8 %v135_v39  ;;  %v6245_v50 = vld [vmem:[#allocation5 + $0x16c] ss:$16 sps:$4 sm:$0xff]   ;;  %v6247_v51 = vld [vmem:[#allocation5 + $0x160] ss:$16 sps:$4 sm:$0xff]   ;;  %v6248_v52 = vld [vmem:[#allocation5 + $0x168] ss:$16 sps:$4 sm:$0xff]  }
  0x6e   :  { %v6249_v54 = vld [vmem:[#allocation5 + $0x184] ss:$16 sps:$4 sm:$0xff]   ;;  %v6273_v55 = vld [vmem:[#allocation3] ss:$40 sps:$4 sm:$0xff]   ;;  %v6276_v56 = vld [vmem:[#allocation3 + $0x50] ss:$40 sps:$4 sm:$0xff]  }
  0x6f   :  { %4154 = vmatpush1.bf16.msra.mxu0 %v6205_v18  ;;  %4564 = vmatpush1.bf16.msra.mxu1 %v6206_v19  ;;  %v7408_v53 = vsub.s32 %v136_v45, %v7405_v46  ;;  %v6251_v57 = vld [vmem:[#allocation5 + $0x18c] ss:$16 sps:$4 sm:$0xff]   ;;  %v6253_v60 = vld [vmem:[#allocation5 + $0x180] ss:$16 sps:$4 sm:$0xff]   ;;  %v6254_v61 = vld [vmem:[#allocation5 + $0x188] ss:$16 sps:$4 sm:$0xff]  }
  0x70   :  { %4155 = vmatprep.subr.bf16.mxu0 %v6207_v20  ;;  %4565 = vmatprep.subr.bf16.mxu1 %v6209_v21  ;;  %v6255_v62 = vld [vmem:[#allocation5 + $0x1a4] ss:$16 sps:$4 sm:$0xff]   ;;  %v6257_v0 = vld [vmem:[#allocation5 + $0x1ac] ss:$16 sps:$4 sm:$0xff]   ;;  %v6259_v2 = vld [vmem:[#allocation5 + $0x1a0] ss:$16 sps:$4 sm:$0xff]  }
  0x71   :  { %v140_v58 = vrot.slane %v6273_v55, %v7408_v53  ;;  %v154_v59 = vrot.slane %v6276_v56, %v7408_v53  ;;  %v6260_v3 = vld [vmem:[#allocation5 + $0x1a8] ss:$16 sps:$4 sm:$0xff]   ;;  %v6261_v4 = vld [vmem:[#allocation5 + $0x1c4] ss:$16 sps:$4 sm:$0xff]   ;;  %v6263_v5 = vld [vmem:[#allocation5 + $0x1cc] ss:$16 sps:$4 sm:$0xff]  }
  0x72   :  { %v6275_v6 = vld [vmem:[#allocation3 + $0x4] ss:$40 sps:$4 sm:$0xff]   ;;  %v6278_v7 = vld [vmem:[#allocation3 + $0x54] ss:$40 sps:$4 sm:$0xff]   ;;  %v6265_v8 = vld [vmem:[#allocation5 + $0x1c0] ss:$16 sps:$4 sm:$0xff]  }
  0x73   :  { %4156 = vmatpush1.bf16.msra.mxu0 %v6211_v22  ;;  %4566 = vmatpush1.bf16.msra.mxu1 %v6212_v23  ;;  %v163_v63 = vcombine.high %v140_v58, %v154_v59  ;;  %v6266_v9 = vld [vmem:[#allocation5 + $0x1c8] ss:$16 sps:$4 sm:$0xff]   ;;  %v6267_v10 = vld [vmem:[#allocation5 + $0x1e4] ss:$16 sps:$4 sm:$0xff]   ;;  %v6269_v11 = vld [vmem:[#allocation5 + $0x1ec] ss:$16 sps:$4 sm:$0xff]   ;;  %v7413_v12 = vrot.slane %v6275_v6, %v7408_v53  ;;  %v7416_v13 = vrot.slane %v6278_v7, %v7408_v53 }
  0x74   :  { %4157 = vmatprep.subr.bf16.mxu0 %v6213_v24  ;;  %4567 = vmatprep.subr.bf16.mxu1 %v6215_v25  ;;  %v6271_v14 = vld [vmem:[#allocation5 + $0x1e0] ss:$16 sps:$4 sm:$0xff]   ;;  %v6272_v15 = vld [vmem:[#allocation5 + $0x1e8] ss:$16 sps:$4 sm:$0xff]   ;;  %v162_v16 = vcombine.low %v140_v58, %v154_v59  ;;  %v6281_v17 = vld [vmem:[#allocation5 + $0x204] ss:$16 sps:$4 sm:$0xff]  }
  0x75   :  { %v331_v1 = vpack.c.bf16 %v163_v63, %v163_v63  ;;  %v6284_v18 = vld [vmem:[#allocation5 + $0x20c] ss:$16 sps:$4 sm:$0xff]   ;;  %v165_v19 = vcombine.high %v7413_v12, %v7416_v13  ;;  %v6279_v20 = vld [vmem:[#allocation5 + $0x200] ss:$16 sps:$4 sm:$0xff]   ;;  %v6282_v21 = vld [vmem:[#allocation5 + $0x208] ss:$16 sps:$4 sm:$0xff]  }
  0x76   :  { %v330_v22 = vpack.c.bf16 %v162_v16, %v162_v16  ;;  %v6287_v23 = vld [vmem:[#allocation5 + $0x224] ss:$16 sps:$4 sm:$0xff]   ;;  %v6290_v24 = vld [vmem:[#allocation5 + $0x22c] ss:$16 sps:$4 sm:$0xff]   ;;  %v6303_v38 = vld [vmem:[#allocation5 + $0x280] ss:$16 sps:$4 sm:$0xff]  }
  0x77   :  { %4158 = vmatpush1.bf16.msra.mxu0 %v6217_v26  ;;  %4568 = vmatpush1.bf16.msra.mxu1 %v6218_v27  ;;  %v333_v25 = vpack.c.bf16 %v165_v19, %v165_v19  ;;  %v6285_v26 = vld [vmem:[#allocation5 + $0x220] ss:$16 sps:$4 sm:$0xff]   ;;  %v6288_v27 = vld [vmem:[#allocation5 + $0x228] ss:$16 sps:$4 sm:$0xff]   ;;  %v6311_v40 = vld [vmem:[#allocation5 + $0x2a4] ss:$16 sps:$4 sm:$0xff]  }
  0x78   :  { %4159 = vmatprep.subr.bf16.mxu0 %v6219_v28  ;;  %4569 = vmatprep.subr.bf16.mxu1 %v6221_v29  ;;  %v6293_v28 = vld [vmem:[#allocation5 + $0x244] ss:$16 sps:$4 sm:$0xff]   ;;  %v6296_v29 = vld [vmem:[#allocation5 + $0x24c] ss:$16 sps:$4 sm:$0xff]   ;;  %v6306_v39 = vld [vmem:[#allocation5 + $0x288] ss:$16 sps:$4 sm:$0xff]  }
  0x79   :  { %4177 = vmatprep.mubr.bf16.mxu0 %v331_v1  ;;  %4587 = vmatprep.mubr.bf16.mxu1 %v331_v1  ;;  %v6320_v45 = vld [vmem:[#allocation5 + $0x2cc] ss:$16 sps:$4 sm:$0xff]   ;;  %v6327_v56 = vld [vmem:[#allocation5 + $0x300] ss:$16 sps:$4 sm:$0xff]   ;;  %v6335_v58 = vld [vmem:[#allocation5 + $0x324] ss:$16 sps:$4 sm:$0xff]  }
  0x7a   :  { %v6332_v55 = vld [vmem:[#allocation5 + $0x30c] ss:$16 sps:$4 sm:$0xff]   ;;  %v6342_v1 = vld [vmem:[#allocation5 + $0x348] ss:$16 sps:$4 sm:$0xff]   ;;  %v6353_v6 = vld [vmem:[#allocation5 + $0x384] ss:$16 sps:$4 sm:$0xff]  }
  0x7b   :  { %4160 = vmatpush1.bf16.msra.mxu0 %v6223_v30  ;;  %4570 = vmatpush1.bf16.msra.mxu1 %v6224_v31  ;;  %v6291_v30 = vld [vmem:[#allocation5 + $0x240] ss:$16 sps:$4 sm:$0xff]   ;;  %v6294_v31 = vld [vmem:[#allocation5 + $0x248] ss:$16 sps:$4 sm:$0xff]   ;;  %v6338_v59 = vld [vmem:[#allocation5 + $0x32c] ss:$16 sps:$4 sm:$0xff]  }
  0x7c   :  { %4161 = vmatprep.subr.bf16.mxu0 %v6225_v32  ;;  %4571 = vmatprep.subr.bf16.mxu1 %v6227_v33  ;;  %v6299_v32 = vld [vmem:[#allocation5 + $0x264] ss:$16 sps:$4 sm:$0xff]   ;;  %v6302_v33 = vld [vmem:[#allocation5 + $0x26c] ss:$16 sps:$4 sm:$0xff]   ;;  %v6366_v19 = vld [vmem:[#allocation5 + $0x3c8] ss:$16 sps:$4 sm:$0xff]  }
  0x7d   :  { %v6344_v63 = vld [vmem:[#allocation5 + $0x34c] ss:$16 sps:$4 sm:$0xff]   ;;  %v6365_v16 = vld [vmem:[#allocation5 + $0x3c4] ss:$16 sps:$4 sm:$0xff]   ;;  %vm4132_vm1 = vcmask 1041408   ;;  %vm5232_vm2 = vcmask 949248  }
  0x7e   :  { %v6356_v7 = vld [vmem:[#allocation5 + $0x38c] ss:$16 sps:$4 sm:$0xff]   ;;  %vm5328_vm3 = vcmask 818176   ;;  %vm5335_vm4 = vcmask 7168  }
  0x7f   :  { %4162 = vmatpush1.bf16.msra.mxu0 %v6229_v34  ;;  %4572 = vmatpush1.bf16.msra.mxu1 %v6230_v35  ;;  %v6297_v34 = vld [vmem:[#allocation5 + $0x260] ss:$16 sps:$4 sm:$0xff]   ;;  %v6300_v35 = vld [vmem:[#allocation5 + $0x268] ss:$16 sps:$4 sm:$0xff]  }
  0x80   :  { %4163 = vmatprep.subr.bf16.mxu0 %v6231_v36  ;;  %4573 = vmatprep.subr.bf16.mxu1 %v6233_v37  ;;  %v6305_v36 = vld [vmem:[#allocation5 + $0x284] ss:$16 sps:$4 sm:$0xff]   ;;  %v6308_v37 = vld [vmem:[#allocation5 + $0x28c] ss:$16 sps:$4 sm:$0xff]  }
  0x83   :  { %4164 = vmatpush1.bf16.msra.mxu0 %v6235_v41  ;;  %4574 = vmatpush1.bf16.msra.mxu1 %v6236_v42  ;;  %v6314_v41 = vld [vmem:[#allocation5 + $0x2ac] ss:$16 sps:$4 sm:$0xff]   ;;  %v6309_v42 = vld [vmem:[#allocation5 + $0x2a0] ss:$16 sps:$4 sm:$0xff]  }
  0x84   :  { %4165 = vmatprep.subr.bf16.mxu0 %v6237_v43  ;;  %4575 = vmatprep.subr.bf16.mxu1 %v6239_v44  ;;  %v6312_v43 = vld [vmem:[#allocation5 + $0x2a8] ss:$16 sps:$4 sm:$0xff]   ;;  %v6317_v44 = vld [vmem:[#allocation5 + $0x2c4] ss:$16 sps:$4 sm:$0xff]  }
  0x87   :  { %4166 = vmatpush1.bf16.msra.mxu0 %v6241_v47  ;;  %4576 = vmatpush1.bf16.msra.mxu1 %v6242_v48  ;;  %v6315_v47 = vld [vmem:[#allocation5 + $0x2c0] ss:$16 sps:$4 sm:$0xff]   ;;  %v6318_v48 = vld [vmem:[#allocation5 + $0x2c8] ss:$16 sps:$4 sm:$0xff]  }
  0x88   :  { %4167 = vmatprep.subr.bf16.mxu0 %v6243_v49  ;;  %4577 = vmatprep.subr.bf16.mxu1 %v6245_v50  ;;  %v6323_v49 = vld [vmem:[#allocation5 + $0x2e4] ss:$16 sps:$4 sm:$0xff]   ;;  %v6326_v50 = vld [vmem:[#allocation5 + $0x2ec] ss:$16 sps:$4 sm:$0xff]  }
  0x8b   :  { %4168 = vmatpush1.bf16.msra.mxu0 %v6247_v51  ;;  %4578 = vmatpush1.bf16.msra.mxu1 %v6248_v52  ;;  %v6321_v51 = vld [vmem:[#allocation5 + $0x2e0] ss:$16 sps:$4 sm:$0xff]   ;;  %v6324_v52 = vld [vmem:[#allocation5 + $0x2e8] ss:$16 sps:$4 sm:$0xff]  }
  0x8c   :  { %4169 = vmatprep.subr.bf16.mxu0 %v6249_v54  ;;  %4579 = vmatprep.subr.bf16.mxu1 %v6251_v57  ;;  %v6329_v54 = vld [vmem:[#allocation5 + $0x304] ss:$16 sps:$4 sm:$0xff]   ;;  %v6330_v57 = vld [vmem:[#allocation5 + $0x308] ss:$16 sps:$4 sm:$0xff]  }
  0x8f   :  { %4170 = vmatpush1.bf16.msra.mxu0 %v6253_v60  ;;  %4580 = vmatpush1.bf16.msra.mxu1 %v6254_v61  ;;  %v6333_v60 = vld [vmem:[#allocation5 + $0x320] ss:$16 sps:$4 sm:$0xff]   ;;  %v6336_v61 = vld [vmem:[#allocation5 + $0x328] ss:$16 sps:$4 sm:$0xff]  }
  0x90   :  { %4171 = vmatprep.subr.bf16.mxu0 %v6255_v62  ;;  %4581 = vmatprep.subr.bf16.mxu1 %v6257_v0  ;;  %v6341_v62 = vld [vmem:[#allocation5 + $0x344] ss:$16 sps:$4 sm:$0xff]   ;;  %v6339_v0 = vld [vmem:[#allocation5 + $0x340] ss:$16 sps:$4 sm:$0xff]  }
  0x93   :  { %4172 = vmatpush1.bf16.msra.mxu0 %v6259_v2  ;;  %4582 = vmatpush1.bf16.msra.mxu1 %v6260_v3  ;;  %v6347_v2 = vld [vmem:[#allocation5 + $0x364] ss:$16 sps:$4 sm:$0xff]   ;;  %v6350_v3 = vld [vmem:[#allocation5 + $0x36c] ss:$16 sps:$4 sm:$0xff]  }
  0x94   :  { %4173 = vmatprep.subr.bf16.mxu0 %v6261_v4  ;;  %4583 = vmatprep.subr.bf16.mxu1 %v6263_v5  ;;  %v6345_v4 = vld [vmem:[#allocation5 + $0x360] ss:$16 sps:$4 sm:$0xff]   ;;  %v6348_v5 = vld [vmem:[#allocation5 + $0x368] ss:$16 sps:$4 sm:$0xff]  }
  0x97   :  { %4174 = vmatpush1.bf16.msra.mxu0 %v6265_v8  ;;  %4584 = vmatpush1.bf16.msra.mxu1 %v6266_v9  ;;  %v6351_v8 = vld [vmem:[#allocation5 + $0x380] ss:$16 sps:$4 sm:$0xff]   ;;  %v6354_v9 = vld [vmem:[#allocation5 + $0x388] ss:$16 sps:$4 sm:$0xff]  }
  0x98   :  { %4175 = vmatprep.subr.bf16.mxu0 %v6267_v10  ;;  %4585 = vmatprep.subr.bf16.mxu1 %v6269_v11  ;;  %v6359_v10 = vld [vmem:[#allocation5 + $0x3a4] ss:$16 sps:$4 sm:$0xff]   ;;  %v6362_v11 = vld [vmem:[#allocation5 + $0x3ac] ss:$16 sps:$4 sm:$0xff]  }
  0x9b   :  { %4176 = vmatpush1.bf16.msra.mxu0 %v6271_v14  ;;  %4586 = vmatpush1.bf16.msra.mxu1 %v6272_v15  ;;  %v6357_v14 = vld [vmem:[#allocation5 + $0x3a0] ss:$16 sps:$4 sm:$0xff]   ;;  %v6360_v15 = vld [vmem:[#allocation5 + $0x3a8] ss:$16 sps:$4 sm:$0xff]  }
  0x9c   :  { %4186 = vmatprep.subr.bf16.mxu0 %v6281_v17  ;;  %4596 = vmatprep.subr.bf16.mxu1 %v6284_v18  ;;  %v6368_v17 = vld [vmem:[#allocation5 + $0x3cc] ss:$16 sps:$4 sm:$0xff]   ;;  %v6363_v18 = vld [vmem:[#allocation5 + $0x3c0] ss:$16 sps:$4 sm:$0xff]  }
  0x9e   :  { %4178 = vmatmul.mubr.bf16.vlgmr.msra.gmra.mrb[0].mxu0 %v330_v22  ;;  %4588 = vmatmul.mubr.bf16.vlgmr.msra.gmra.mrb[0].mxu1 %v330_v22  ;;  %v6369_v22 = vld [vmem:[#allocation5 + $0x3e0] ss:$16 sps:$4 sm:$0xff]  }
  0x9f   :  { %4187 = vmatpush1.bf16.msra.mxu0 %v6279_v20  ;;  %4597 = vmatpush1.bf16.msra.mxu1 %v6282_v21  ;;  %v6371_v20 = vld [vmem:[#allocation5 + $0x3e4] ss:$16 sps:$4 sm:$0xff]   ;;  %v6374_v21 = vld [vmem:[#allocation5 + $0x3ec] ss:$16 sps:$4 sm:$0xff]  }
  0xa0   :  { %4188 = vmatprep.subr.bf16.mxu0 %v6287_v23  ;;  %4598 = vmatprep.subr.bf16.mxu1 %v6290_v24  ;;  %v6372_v23 = vld [vmem:[#allocation5 + $0x3e8] ss:$16 sps:$4 sm:$0xff]   ;;  %v164_v24 = vcombine.low %v7413_v12, %v7416_v13 }
  0xa1   :  { %4218 = vmatprep.mubr.bf16.mxu0 %v333_v25  ;;  %4628 = vmatprep.mubr.bf16.mxu1 %v333_v25  ;;  %v6377_v25 = vld [vmem:[#allocation5 + $0x404] ss:$16 sps:$4 sm:$0xff]   ;;  %v6471_v12 = vld [vmem:[#allocation3 + $0x8] ss:$40 sps:$4 sm:$0xff]   ;;  %v6473_v13 = vld [vmem:[#allocation3 + $0x58] ss:$40 sps:$4 sm:$0xff]  }
  0xa3   :  { %4189 = vmatpush1.bf16.msra.mxu0 %v6285_v26  ;;  %4599 = vmatpush1.bf16.msra.mxu1 %v6288_v27  ;;  %v6380_v26 = vld [vmem:[#allocation5 + $0x40c] ss:$16 sps:$4 sm:$0xff]   ;;  %v6375_v27 = vld [vmem:[#allocation5 + $0x400] ss:$16 sps:$4 sm:$0xff]  }
  0xa4   :  { %4190 = vmatprep.subr.bf16.mxu0 %v6293_v28  ;;  %4600 = vmatprep.subr.bf16.mxu1 %v6296_v29  ;;  %v6378_v28 = vld [vmem:[#allocation5 + $0x408] ss:$16 sps:$4 sm:$0xff]   ;;  %v332_v29 = vpack.c.bf16 %v164_v24, %v164_v24  ;;  %v6453_v24 = vld [vmem:[#allocation5 + $0x5a0] ss:$16 sps:$4 sm:$0xff]  }
  0xa7   :  { %4191 = vmatpush1.bf16.msra.mxu0 %v6291_v30  ;;  %4601 = vmatpush1.bf16.msra.mxu1 %v6294_v31  ;;  %v6383_v30 = vld [vmem:[#allocation5 + $0x424] ss:$16 sps:$4 sm:$0xff]   ;;  %v6386_v31 = vld [vmem:[#allocation5 + $0x42c] ss:$16 sps:$4 sm:$0xff]  }
  0xa8   :  { %4192 = vmatprep.subr.bf16.mxu0 %v6299_v32  ;;  %4602 = vmatprep.subr.bf16.mxu1 %v6302_v33  ;;  %v6381_v32 = vld [vmem:[#allocation5 + $0x420] ss:$16 sps:$4 sm:$0xff]   ;;  %v6384_v33 = vld [vmem:[#allocation5 + $0x428] ss:$16 sps:$4 sm:$0xff]  }
  0xab   :  { %4193 = vmatpush1.bf16.msra.mxu0 %v6297_v34  ;;  %4603 = vmatpush1.bf16.msra.mxu1 %v6300_v35  ;;  %v6389_v34 = vld [vmem:[#allocation5 + $0x444] ss:$16 sps:$4 sm:$0xff]   ;;  %v6392_v35 = vld [vmem:[#allocation5 + $0x44c] ss:$16 sps:$4 sm:$0xff]  }
  0xac   :  { %4194 = vmatprep.subr.bf16.mxu0 %v6305_v36  ;;  %4604 = vmatprep.subr.bf16.mxu1 %v6308_v37  ;;  %v7423_v36 = vrot.slane %v6471_v12, %v7408_v53  ;;  %v7426_v37 = vrot.slane %v6473_v13, %v7408_v53 }
  0xaf   :  { %4195 = vmatpush1.bf16.msra.mxu0 %v6303_v38  ;;  %4605 = vmatpush1.bf16.msra.mxu1 %v6306_v39  ;;  %v6387_v38 = vld [vmem:[#allocation5 + $0x440] ss:$16 sps:$4 sm:$0xff]   ;;  %v6390_v39 = vld [vmem:[#allocation5 + $0x448] ss:$16 sps:$4 sm:$0xff]  }
  0xb0   :  { %4196 = vmatprep.subr.bf16.mxu0 %v6311_v40  ;;  %4606 = vmatprep.subr.bf16.mxu1 %v6314_v41  ;;  %v199_v40 = vcombine.high %v7423_v36, %v7426_v37  ;;  %v6395_v41 = vld [vmem:[#allocation5 + $0x464] ss:$16 sps:$4 sm:$0xff]  }
  0xb3   :  { %4197 = vmatpush1.bf16.msra.mxu0 %v6309_v42  ;;  %4607 = vmatpush1.bf16.msra.mxu1 %v6312_v43  ;;  %v6398_v42 = vld [vmem:[#allocation5 + $0x46c] ss:$16 sps:$4 sm:$0xff]   ;;  %v335_v43 = vpack.c.bf16 %v199_v40, %v199_v40 }
  0xb4   :  { %4198 = vmatprep.subr.bf16.mxu0 %v6317_v44  ;;  %4608 = vmatprep.subr.bf16.mxu1 %v6320_v45  ;;  %v6393_v44 = vld [vmem:[#allocation5 + $0x460] ss:$16 sps:$4 sm:$0xff]   ;;  %v6396_v45 = vld [vmem:[#allocation5 + $0x468] ss:$16 sps:$4 sm:$0xff]   ;;  %v6480_v40 = vld [vmem:[#allocation5 + $0x60c] ss:$16 sps:$4 sm:$0xff]  }
  0xb7   :  { %4199 = vmatpush1.bf16.msra.mxu0 %v6315_v47  ;;  %4609 = vmatpush1.bf16.msra.mxu1 %v6318_v48  ;;  %v6401_v47 = vld [vmem:[#allocation5 + $0x484] ss:$16 sps:$4 sm:$0xff]   ;;  %v6404_v48 = vld [vmem:[#allocation5 + $0x48c] ss:$16 sps:$4 sm:$0xff]  }
  0xb8   :  { %4200 = vmatprep.subr.bf16.mxu0 %v6323_v49  ;;  %4610 = vmatprep.subr.bf16.mxu1 %v6326_v50  ;;  %v6399_v49 = vld [vmem:[#allocation5 + $0x480] ss:$16 sps:$4 sm:$0xff]   ;;  %v6402_v50 = vld [vmem:[#allocation5 + $0x488] ss:$16 sps:$4 sm:$0xff]  }
  0xbb   :  { %4201 = vmatpush1.bf16.msra.mxu0 %v6321_v51  ;;  %4611 = vmatpush1.bf16.msra.mxu1 %v6324_v52  ;;  %v6407_v51 = vld [vmem:[#allocation5 + $0x4a4] ss:$16 sps:$4 sm:$0xff]   ;;  %v6410_v52 = vld [vmem:[#allocation5 + $0x4ac] ss:$16 sps:$4 sm:$0xff]  }
  0xbc   :  { %4202 = vmatprep.subr.bf16.mxu0 %v6329_v54  ;;  %4612 = vmatprep.subr.bf16.mxu1 %v6332_v55  ;;  %v6405_v54 = vld [vmem:[#allocation5 + $0x4a0] ss:$16 sps:$4 sm:$0xff]   ;;  %v6408_v55 = vld [vmem:[#allocation5 + $0x4a8] ss:$16 sps:$4 sm:$0xff]  }
  0xbf   :  { %4203 = vmatpush1.bf16.msra.mxu0 %v6327_v56  ;;  %4613 = vmatpush1.bf16.msra.mxu1 %v6330_v57  ;;  %v6413_v56 = vld [vmem:[#allocation5 + $0x4c4] ss:$16 sps:$4 sm:$0xff]   ;;  %v6416_v57 = vld [vmem:[#allocation5 + $0x4cc] ss:$16 sps:$4 sm:$0xff]  }
  0xc0   :  { %4204 = vmatprep.subr.bf16.mxu0 %v6335_v58  ;;  %4614 = vmatprep.subr.bf16.mxu1 %v6338_v59  ;;  %v6411_v58 = vld [vmem:[#allocation5 + $0x4c0] ss:$16 sps:$4 sm:$0xff]   ;;  %v6414_v59 = vld [vmem:[#allocation5 + $0x4c8] ss:$16 sps:$4 sm:$0xff]  }
  0xc3   :  { %4205 = vmatpush1.bf16.msra.mxu0 %v6333_v60  ;;  %4615 = vmatpush1.bf16.msra.mxu1 %v6336_v61  ;;  %v6419_v60 = vld [vmem:[#allocation5 + $0x4e4] ss:$16 sps:$4 sm:$0xff]   ;;  %v6422_v61 = vld [vmem:[#allocation5 + $0x4ec] ss:$16 sps:$4 sm:$0xff]  }
  0xc4   :  { %4206 = vmatprep.subr.bf16.mxu0 %v6341_v62  ;;  %4616 = vmatprep.subr.bf16.mxu1 %v6344_v63  ;;  %v6417_v62 = vld [vmem:[#allocation5 + $0x4e0] ss:$16 sps:$4 sm:$0xff]   ;;  %v6420_v63 = vld [vmem:[#allocation5 + $0x4e8] ss:$16 sps:$4 sm:$0xff]  }
  0xc7   :  { %4207 = vmatpush1.bf16.msra.mxu0 %v6339_v0  ;;  %4617 = vmatpush1.bf16.msra.mxu1 %v6342_v1  ;;  %v6425_v0 = vld [vmem:[#allocation5 + $0x504] ss:$16 sps:$4 sm:$0xff]   ;;  %v6428_v1 = vld [vmem:[#allocation5 + $0x50c] ss:$16 sps:$4 sm:$0xff]  }
  0xc8   :  { %4208 = vmatprep.subr.bf16.mxu0 %v6347_v2  ;;  %4618 = vmatprep.subr.bf16.mxu1 %v6350_v3  ;;  %v6423_v2 = vld [vmem:[#allocation5 + $0x500] ss:$16 sps:$4 sm:$0xff]   ;;  %v6426_v3 = vld [vmem:[#allocation5 + $0x508] ss:$16 sps:$4 sm:$0xff]  }
  0xcb   :  { %4209 = vmatpush1.bf16.msra.mxu0 %v6345_v4  ;;  %4619 = vmatpush1.bf16.msra.mxu1 %v6348_v5  ;;  %v6431_v4 = vld [vmem:[#allocation5 + $0x524] ss:$16 sps:$4 sm:$0xff]   ;;  %v6434_v5 = vld [vmem:[#allocation5 + $0x52c] ss:$16 sps:$4 sm:$0xff]  }
  0xcc   :  { %4210 = vmatprep.subr.bf16.mxu0 %v6353_v6  ;;  %4620 = vmatprep.subr.bf16.mxu1 %v6356_v7  ;;  %v6429_v6 = vld [vmem:[#allocation5 + $0x520] ss:$16 sps:$4 sm:$0xff]   ;;  %v6432_v7 = vld [vmem:[#allocation5 + $0x528] ss:$16 sps:$4 sm:$0xff]  }
  0xcf   :  { %4211 = vmatpush1.bf16.msra.mxu0 %v6351_v8  ;;  %4621 = vmatpush1.bf16.msra.mxu1 %v6354_v9  ;;  %v6437_v8 = vld [vmem:[#allocation5 + $0x544] ss:$16 sps:$4 sm:$0xff]   ;;  %v6440_v9 = vld [vmem:[#allocation5 + $0x54c] ss:$16 sps:$4 sm:$0xff]  }
  0xd0   :  { %4212 = vmatprep.subr.bf16.mxu0 %v6359_v10  ;;  %4622 = vmatprep.subr.bf16.mxu1 %v6362_v11  ;;  %v6435_v10 = vld [vmem:[#allocation5 + $0x540] ss:$16 sps:$4 sm:$0xff]   ;;  %v6438_v11 = vld [vmem:[#allocation5 + $0x548] ss:$16 sps:$4 sm:$0xff]  }
  0xd3   :  { %4213 = vmatpush1.bf16.msra.mxu0 %v6357_v14  ;;  %4623 = vmatpush1.bf16.msra.mxu1 %v6360_v15  ;;  %v6443_v14 = vld [vmem:[#allocation5 + $0x564] ss:$16 sps:$4 sm:$0xff]   ;;  %v6446_v15 = vld [vmem:[#allocation5 + $0x56c] ss:$16 sps:$4 sm:$0xff]  }
  0xd4   :  { %4214 = vmatprep.subr.bf16.mxu0 %v6365_v16  ;;  %4624 = vmatprep.subr.bf16.mxu1 %v6368_v17  ;;  %v6441_v16 = vld [vmem:[#allocation5 + $0x560] ss:$16 sps:$4 sm:$0xff]   ;;  %v6444_v17 = vld [vmem:[#allocation5 + $0x568] ss:$16 sps:$4 sm:$0xff]  }
  0xd7   :  { %4215 = vmatpush1.bf16.msra.mxu0 %v6363_v18  ;;  %4625 = vmatpush1.bf16.msra.mxu1 %v6366_v19  ;;  %v6449_v18 = vld [vmem:[#allocation5 + $0x584] ss:$16 sps:$4 sm:$0xff]   ;;  %v6452_v19 = vld [vmem:[#allocation5 + $0x58c] ss:$16 sps:$4 sm:$0xff]  }
  0xd8   :  { %4216 = vmatprep.subr.bf16.mxu0 %v6371_v20  ;;  %4626 = vmatprep.subr.bf16.mxu1 %v6374_v21  ;;  %v6447_v20 = vld [vmem:[#allocation5 + $0x580] ss:$16 sps:$4 sm:$0xff]   ;;  %v6450_v21 = vld [vmem:[#allocation5 + $0x588] ss:$16 sps:$4 sm:$0xff]  }
  0xdb   :  { %4217 = vmatpush1.bf16.msra.mxu0 %v6369_v22  ;;  %4627 = vmatpush1.bf16.msra.mxu1 %v6372_v23  ;;  %v6455_v22 = vld [vmem:[#allocation5 + $0x5a4] ss:$16 sps:$4 sm:$0xff]   ;;  %v6458_v23 = vld [vmem:[#allocation5 + $0x5ac] ss:$16 sps:$4 sm:$0xff]  }
  0xdc   :  { %4227 = vmatprep.subr.bf16.mxu0 %v6377_v25  ;;  %4637 = vmatprep.subr.bf16.mxu1 %v6380_v26  ;;  %v6456_v25 = vld [vmem:[#allocation5 + $0x5a8] ss:$16 sps:$4 sm:$0xff]   ;;  %v6461_v26 = vld [vmem:[#allocation5 + $0x5c4] ss:$16 sps:$4 sm:$0xff]  }
  0xde   :  { %4219 = vmatmul.mubr.bf16.vlgmr.msra.gmra.mrb[0].mxu0 %v332_v29  ;;  %4629 = vmatmul.mubr.bf16.vlgmr.msra.gmra.mrb[0].mxu1 %v332_v29  ;;  %v6572_v29 = vld [vmem:[#allocation3 + $0x5c] ss:$40 sps:$4 sm:$0xff]  }
  0xdf   :  { %4228 = vmatpush1.bf16.msra.mxu0 %v6375_v27  ;;  %4638 = vmatpush1.bf16.msra.mxu1 %v6378_v28  ;;  %v6464_v27 = vld [vmem:[#allocation5 + $0x5cc] ss:$16 sps:$4 sm:$0xff]   ;;  %v7434_v13 = vrot.slane %v6572_v29, %v7408_v53 }
  0xe0   :  { %4229 = vmatprep.subr.bf16.mxu0 %v6383_v30  ;;  %4639 = vmatprep.subr.bf16.mxu1 %v6386_v31  ;;  %v6571_v28 = vld [vmem:[#allocation3 + $0xc] ss:$40 sps:$4 sm:$0xff]   ;;  %v6459_v30 = vld [vmem:[#allocation5 + $0x5c0] ss:$16 sps:$4 sm:$0xff]   ;;  %v6462_v31 = vld [vmem:[#allocation5 + $0x5c8] ss:$16 sps:$4 sm:$0xff]  }
  0xe1   :  { %4259 = vmatprep.mubr.bf16.mxu0 %v335_v43  ;;  %4669 = vmatprep.mubr.bf16.mxu1 %v335_v43  ;;  %v7431_v12 = vrot.slane %v6571_v28, %v7408_v53  ;;  %v6478_v43 = vld [vmem:[#allocation5 + $0x608] ss:$16 sps:$4 sm:$0xff]   ;;  %v6549_v28 = vld [vmem:[#allocation5 + $0x784] ss:$16 sps:$4 sm:$0xff]   ;;  %v6552_v29 = vld [vmem:[#allocation5 + $0x78c] ss:$16 sps:$4 sm:$0xff]  }
  0xe3   :  { %4230 = vmatpush1.bf16.msra.mxu0 %v6381_v32  ;;  %4640 = vmatpush1.bf16.msra.mxu1 %v6384_v33  ;;  %v6467_v32 = vld [vmem:[#allocation5 + $0x5e4] ss:$16 sps:$4 sm:$0xff]   ;;  %v6470_v33 = vld [vmem:[#allocation5 + $0x5ec] ss:$16 sps:$4 sm:$0xff]  }
  0xe4   :  { %4231 = vmatprep.subr.bf16.mxu0 %v6389_v34  ;;  %4641 = vmatprep.subr.bf16.mxu1 %v6392_v35  ;;  %v6465_v34 = vld [vmem:[#allocation5 + $0x5e0] ss:$16 sps:$4 sm:$0xff]   ;;  %v6468_v35 = vld [vmem:[#allocation5 + $0x5e8] ss:$16 sps:$4 sm:$0xff]  }
  0xe7   :  { %4232 = vmatpush1.bf16.msra.mxu0 %v6387_v38  ;;  %4642 = vmatpush1.bf16.msra.mxu1 %v6390_v39  ;;  %v198_v38 = vcombine.low %v7423_v36, %v7426_v37  ;;  %v6477_v39 = vld [vmem:[#allocation5 + $0x604] ss:$16 sps:$4 sm:$0xff]   ;;  %v6481_v36 = vld [vmem:[#allocation5 + $0x620] ss:$16 sps:$4 sm:$0xff]   ;;  %v6484_v37 = vld [vmem:[#allocation5 + $0x628] ss:$16 sps:$4 sm:$0xff]  }
  0xe8   :  { %4233 = vmatprep.subr.bf16.mxu0 %v6395_v41  ;;  %4643 = vmatprep.subr.bf16.mxu1 %v6398_v42  ;;  %v201_v41 = vcombine.high %v7431_v12, %v7434_v13  ;;  %v6475_v42 = vld [vmem:[#allocation5 + $0x600] ss:$16 sps:$4 sm:$0xff]  }
  0xeb   :  { %4234 = vmatpush1.bf16.msra.mxu0 %v6393_v44  ;;  %4644 = vmatpush1.bf16.msra.mxu1 %v6396_v45  ;;  %v334_v44 = vpack.c.bf16 %v198_v38, %v198_v38  ;;  %v6483_v45 = vld [vmem:[#allocation5 + $0x624] ss:$16 sps:$4 sm:$0xff]  }
  0xec   :  { %4235 = vmatprep.subr.bf16.mxu0 %v6401_v47  ;;  %4645 = vmatprep.subr.bf16.mxu1 %v6404_v48  ;;  %v6486_v47 = vld [vmem:[#allocation5 + $0x62c] ss:$16 sps:$4 sm:$0xff]   ;;  %v337_v48 = vpack.c.bf16 %v201_v41, %v201_v41  ;;  %v6561_v38 = vld [vmem:[#allocation5 + $0x7c4] ss:$16 sps:$4 sm:$0xff]   ;;  %v6671_v41 = vld [vmem:[#allocation3 + $0x60] ss:$40 sps:$4 sm:$0xff]  }
  0xef   :  { %4236 = vmatpush1.bf16.msra.mxu0 %v6399_v49  ;;  %4646 = vmatpush1.bf16.msra.mxu1 %v6402_v50  ;;  %v6489_v49 = vld [vmem:[#allocation5 + $0x644] ss:$16 sps:$4 sm:$0xff]   ;;  %v6492_v50 = vld [vmem:[#allocation5 + $0x64c] ss:$16 sps:$4 sm:$0xff]  }
  0xf0   :  { %4237 = vmatprep.subr.bf16.mxu0 %v6407_v51  ;;  %4647 = vmatprep.subr.bf16.mxu1 %v6410_v52  ;;  %v6487_v51 = vld [vmem:[#allocation5 + $0x640] ss:$16 sps:$4 sm:$0xff]   ;;  %v6490_v52 = vld [vmem:[#allocation5 + $0x648] ss:$16 sps:$4 sm:$0xff]  }
  0xf3   :  { %4238 = vmatpush1.bf16.msra.mxu0 %v6405_v54  ;;  %4648 = vmatpush1.bf16.msra.mxu1 %v6408_v55  ;;  %v6495_v54 = vld [vmem:[#allocation5 + $0x664] ss:$16 sps:$4 sm:$0xff]   ;;  %v6498_v55 = vld [vmem:[#allocation5 + $0x66c] ss:$16 sps:$4 sm:$0xff]  }
  0xf4   :  { %4239 = vmatprep.subr.bf16.mxu0 %v6413_v56  ;;  %4649 = vmatprep.subr.bf16.mxu1 %v6416_v57  ;;  %v6493_v56 = vld [vmem:[#allocation5 + $0x660] ss:$16 sps:$4 sm:$0xff]   ;;  %v6496_v57 = vld [vmem:[#allocation5 + $0x668] ss:$16 sps:$4 sm:$0xff]  }
  0xf7   :  { %4240 = vmatpush1.bf16.msra.mxu0 %v6411_v58  ;;  %4650 = vmatpush1.bf16.msra.mxu1 %v6414_v59  ;;  %v6501_v58 = vld [vmem:[#allocation5 + $0x684] ss:$16 sps:$4 sm:$0xff]   ;;  %v6504_v59 = vld [vmem:[#allocation5 + $0x68c] ss:$16 sps:$4 sm:$0xff]  }
  0xf8   :  { %4241 = vmatprep.subr.bf16.mxu0 %v6419_v60  ;;  %4651 = vmatprep.subr.bf16.mxu1 %v6422_v61  ;;  %v6499_v60 = vld [vmem:[#allocation5 + $0x680] ss:$16 sps:$4 sm:$0xff]   ;;  %v6502_v61 = vld [vmem:[#allocation5 + $0x688] ss:$16 sps:$4 sm:$0xff]  }
  0xfb   :  { %4242 = vmatpush1.bf16.msra.mxu0 %v6417_v62  ;;  %4652 = vmatpush1.bf16.msra.mxu1 %v6420_v63  ;;  %v6507_v62 = vld [vmem:[#allocation5 + $0x6a4] ss:$16 sps:$4 sm:$0xff]   ;;  %v6510_v63 = vld [vmem:[#allocation5 + $0x6ac] ss:$16 sps:$4 sm:$0xff]  }
  0xfc   :  { %4243 = vmatprep.subr.bf16.mxu0 %v6425_v0  ;;  %4653 = vmatprep.subr.bf16.mxu1 %v6428_v1  ;;  %v6505_v0 = vld [vmem:[#allocation5 + $0x6a0] ss:$16 sps:$4 sm:$0xff]   ;;  %v6508_v1 = vld [vmem:[#allocation5 + $0x6a8] ss:$16 sps:$4 sm:$0xff]  }
  0xff   :  { %4244 = vmatpush1.bf16.msra.mxu0 %v6423_v2  ;;  %4654 = vmatpush1.bf16.msra.mxu1 %v6426_v3  ;;  %v6513_v2 = vld [vmem:[#allocation5 + $0x6c4] ss:$16 sps:$4 sm:$0xff]   ;;  %v6516_v3 = vld [vmem:[#allocation5 + $0x6cc] ss:$16 sps:$4 sm:$0xff]  }
 0x100   :  { %4245 = vmatprep.subr.bf16.mxu0 %v6431_v4  ;;  %4655 = vmatprep.subr.bf16.mxu1 %v6434_v5  ;;  %v6511_v4 = vld [vmem:[#allocation5 + $0x6c0] ss:$16 sps:$4 sm:$0xff]   ;;  %v6514_v5 = vld [vmem:[#allocation5 + $0x6c8] ss:$16 sps:$4 sm:$0xff]  }
 0x103   :  { %4246 = vmatpush1.bf16.msra.mxu0 %v6429_v6  ;;  %4656 = vmatpush1.bf16.msra.mxu1 %v6432_v7  ;;  %v6519_v6 = vld [vmem:[#allocation5 + $0x6e4] ss:$16 sps:$4 sm:$0xff]   ;;  %v6522_v7 = vld [vmem:[#allocation5 + $0x6ec] ss:$16 sps:$4 sm:$0xff]  }
 0x104   :  { %4247 = vmatprep.subr.bf16.mxu0 %v6437_v8  ;;  %4657 = vmatprep.subr.bf16.mxu1 %v6440_v9  ;;  %v6517_v8 = vld [vmem:[#allocation5 + $0x6e0] ss:$16 sps:$4 sm:$0xff]   ;;  %v6520_v9 = vld [vmem:[#allocation5 + $0x6e8] ss:$16 sps:$4 sm:$0xff]  }
 0x107   :  { %4248 = vmatpush1.bf16.msra.mxu0 %v6435_v10  ;;  %4658 = vmatpush1.bf16.msra.mxu1 %v6438_v11  ;;  %v6525_v10 = vld [vmem:[#allocation5 + $0x704] ss:$16 sps:$4 sm:$0xff]   ;;  %v6528_v11 = vld [vmem:[#allocation5 + $0x70c] ss:$16 sps:$4 sm:$0xff]  }
 0x108   :  { %4249 = vmatprep.subr.bf16.mxu0 %v6443_v14  ;;  %4659 = vmatprep.subr.bf16.mxu1 %v6446_v15  ;;  %v6523_v14 = vld [vmem:[#allocation5 + $0x700] ss:$16 sps:$4 sm:$0xff]   ;;  %v6526_v15 = vld [vmem:[#allocation5 + $0x708] ss:$16 sps:$4 sm:$0xff]  }
 0x10b   :  { %4250 = vmatpush1.bf16.msra.mxu0 %v6441_v16  ;;  %4660 = vmatpush1.bf16.msra.mxu1 %v6444_v17  ;;  %v6531_v16 = vld [vmem:[#allocation5 + $0x724] ss:$16 sps:$4 sm:$0xff]   ;;  %v6534_v17 = vld [vmem:[#allocation5 + $0x72c] ss:$16 sps:$4 sm:$0xff]  }
 0x10c   :  { %4251 = vmatprep.subr.bf16.mxu0 %v6449_v18  ;;  %4661 = vmatprep.subr.bf16.mxu1 %v6452_v19  ;;  %v6529_v18 = vld [vmem:[#allocation5 + $0x720] ss:$16 sps:$4 sm:$0xff]   ;;  %v6532_v19 = vld [vmem:[#allocation5 + $0x728] ss:$16 sps:$4 sm:$0xff]  }
 0x10f   :  { %4252 = vmatpush1.bf16.msra.mxu0 %v6447_v20  ;;  %4662 = vmatpush1.bf16.msra.mxu1 %v6450_v21  ;;  %v6537_v20 = vld [vmem:[#allocation5 + $0x744] ss:$16 sps:$4 sm:$0xff]   ;;  %v6540_v21 = vld [vmem:[#allocation5 + $0x74c] ss:$16 sps:$4 sm:$0xff]  }
 0x110   :  { %4253 = vmatprep.subr.bf16.mxu0 %v6455_v22  ;;  %4663 = vmatprep.subr.bf16.mxu1 %v6458_v23  ;;  %v6535_v22 = vld [vmem:[#allocation5 + $0x740] ss:$16 sps:$4 sm:$0xff]   ;;  %v6538_v23 = vld [vmem:[#allocation5 + $0x748] ss:$16 sps:$4 sm:$0xff]  }
 0x113   :  { %4254 = vmatpush1.bf16.msra.mxu0 %v6453_v24  ;;  %4664 = vmatpush1.bf16.msra.mxu1 %v6456_v25  ;;  %v6543_v24 = vld [vmem:[#allocation5 + $0x764] ss:$16 sps:$4 sm:$0xff]   ;;  %v6546_v25 = vld [vmem:[#allocation5 + $0x76c] ss:$16 sps:$4 sm:$0xff]  }
 0x114   :  { %4255 = vmatprep.subr.bf16.mxu0 %v6461_v26  ;;  %4665 = vmatprep.subr.bf16.mxu1 %v6464_v27  ;;  %v6541_v26 = vld [vmem:[#allocation5 + $0x760] ss:$16 sps:$4 sm:$0xff]   ;;  %v6544_v27 = vld [vmem:[#allocation5 + $0x768] ss:$16 sps:$4 sm:$0xff]  }
 0x117   :  { %4256 = vmatpush1.bf16.msra.mxu0 %v6459_v30  ;;  %4666 = vmatpush1.bf16.msra.mxu1 %v6462_v31  ;;  %v6547_v30 = vld [vmem:[#allocation5 + $0x780] ss:$16 sps:$4 sm:$0xff]   ;;  %v6550_v31 = vld [vmem:[#allocation5 + $0x788] ss:$16 sps:$4 sm:$0xff]  }
 0x118   :  { %4257 = vmatprep.subr.bf16.mxu0 %v6467_v32  ;;  %4667 = vmatprep.subr.bf16.mxu1 %v6470_v33  ;;  %v6555_v32 = vld [vmem:[#allocation5 + $0x7a4] ss:$16 sps:$4 sm:$0xff]   ;;  %v6558_v33 = vld [vmem:[#allocation5 + $0x7ac] ss:$16 sps:$4 sm:$0xff]  }
 0x11b   :  { %4258 = vmatpush1.bf16.msra.mxu0 %v6465_v34  ;;  %4668 = vmatpush1.bf16.msra.mxu1 %v6468_v35  ;;  %v6553_v34 = vld [vmem:[#allocation5 + $0x7a0] ss:$16 sps:$4 sm:$0xff]   ;;  %v6556_v35 = vld [vmem:[#allocation5 + $0x7a8] ss:$16 sps:$4 sm:$0xff]  }
 0x11c   :  { %4268 = vmatprep.subr.bf16.mxu0 %v6477_v39  ;;  %4678 = vmatprep.subr.bf16.mxu1 %v6480_v40  ;;  %v6564_v39 = vld [vmem:[#allocation5 + $0x7cc] ss:$16 sps:$4 sm:$0xff]   ;;  %v6669_v40 = vld [vmem:[#allocation3 + $0x10] ss:$40 sps:$4 sm:$0xff]  }
 0x11e   :  { %4260 = vmatmul.mubr.bf16.vlgmr.msra.gmra.mrb[0].mxu0 %v334_v44  ;;  %4670 = vmatmul.mubr.bf16.vlgmr.msra.gmra.mrb[0].mxu1 %v334_v44  ;;  %v6567_v44 = vld [vmem:[#allocation5 + $0x7e4] ss:$16 sps:$4 sm:$0xff]  }
 0x11f   :  { %4269 = vmatpush1.bf16.msra.mxu0 %v6475_v42  ;;  %4679 = vmatpush1.bf16.msra.mxu1 %v6478_v43  ;;  %v6559_v42 = vld [vmem:[#allocation5 + $0x7c0] ss:$16 sps:$4 sm:$0xff]   ;;  %v6562_v43 = vld [vmem:[#allocation5 + $0x7c8] ss:$16 sps:$4 sm:$0xff]  }
 0x120   :  { %4270 = vmatprep.subr.bf16.mxu0 %v6483_v45  ;;  %4680 = vmatprep.subr.bf16.mxu1 %v6486_v47  ;;  %v6570_v45 = vld [vmem:[#allocation5 + $0x7ec] ss:$16 sps:$4 sm:$0xff]   ;;  %v7441_v47 = vrot.slane %v6669_v40, %v7408_v53  ;;  %v6647_v40 = vld [vmem:[#allocation5 + $0x984] ss:$16 sps:$4 sm:$0xff]  }
 0x121   :  { %4300 = vmatprep.mubr.bf16.mxu0 %v337_v48  ;;  %4710 = vmatprep.mubr.bf16.mxu1 %v337_v48  ;;  %v7444_v48 = vrot.slane %v6671_v41, %v7408_v53  ;;  %v6650_v41 = vld [vmem:[#allocation5 + $0x98c] ss:$16 sps:$4 sm:$0xff]  }
 0x123   :  { %4271 = vmatpush1.bf16.msra.mxu0 %v6481_v36  ;;  %4681 = vmatpush1.bf16.msra.mxu1 %v6484_v37  ;;  %v200_v36 = vcombine.low %v7431_v12, %v7434_v13  ;;  %v6565_v37 = vld [vmem:[#allocation5 + $0x7e0] ss:$16 sps:$4 sm:$0xff]   ;;  %v6584_v12 = vld [vmem:[#allocation5 + $0x82c] ss:$16 sps:$4 sm:$0xff]  }
 0x124   :  { %4272 = vmatprep.subr.bf16.mxu0 %v6489_v49  ;;  %4682 = vmatprep.subr.bf16.mxu1 %v6492_v50  ;;  %v6568_v49 = vld [vmem:[#allocation5 + $0x7e8] ss:$16 sps:$4 sm:$0xff]   ;;  %v6575_v50 = vld [vmem:[#allocation5 + $0x804] ss:$16 sps:$4 sm:$0xff]  }
 0x127   :  { %4273 = vmatpush1.bf16.msra.mxu0 %v6487_v51  ;;  %4683 = vmatpush1.bf16.msra.mxu1 %v6490_v52  ;;  %v6578_v51 = vld [vmem:[#allocation5 + $0x80c] ss:$16 sps:$4 sm:$0xff]   ;;  %v235_v52 = vcombine.high %v7441_v47, %v7444_v48 }
 0x128   :  { %4274 = vmatprep.subr.bf16.mxu0 %v6495_v54  ;;  %4684 = vmatprep.subr.bf16.mxu1 %v6498_v55  ;;  %v336_v54 = vpack.c.bf16 %v200_v36, %v200_v36  ;;  %v6573_v55 = vld [vmem:[#allocation5 + $0x800] ss:$16 sps:$4 sm:$0xff]  }
 0x129   :  { %v339_v13 = vpack.c.bf16 %v235_v52, %v235_v52  ;;  %v6651_v36 = vld [vmem:[#allocation5 + $0x9a0] ss:$16 sps:$4 sm:$0xff]   ;;  %v6770_v52 = vld [vmem:[#allocation3 + $0x64] ss:$40 sps:$4 sm:$0xff]  }
 0x12b   :  { %4275 = vmatpush1.bf16.msra.mxu0 %v6493_v56  ;;  %4685 = vmatpush1.bf16.msra.mxu1 %v6496_v57  ;;  %v6576_v56 = vld [vmem:[#allocation5 + $0x808] ss:$16 sps:$4 sm:$0xff]   ;;  %v6581_v57 = vld [vmem:[#allocation5 + $0x824] ss:$16 sps:$4 sm:$0xff]  }
 0x12c   :  { %4276 = vmatprep.subr.bf16.mxu0 %v6501_v58  ;;  %4686 = vmatprep.subr.bf16.mxu1 %v6504_v59  ;;  %v6579_v58 = vld [vmem:[#allocation5 + $0x820] ss:$16 sps:$4 sm:$0xff]   ;;  %v6582_v59 = vld [vmem:[#allocation5 + $0x828] ss:$16 sps:$4 sm:$0xff]  }
 0x12f   :  { %4277 = vmatpush1.bf16.msra.mxu0 %v6499_v60  ;;  %4687 = vmatpush1.bf16.msra.mxu1 %v6502_v61  ;;  %v6587_v60 = vld [vmem:[#allocation5 + $0x844] ss:$16 sps:$4 sm:$0xff]   ;;  %v6590_v61 = vld [vmem:[#allocation5 + $0x84c] ss:$16 sps:$4 sm:$0xff]  }
 0x130   :  { %4278 = vmatprep.subr.bf16.mxu0 %v6507_v62  ;;  %4688 = vmatprep.subr.bf16.mxu1 %v6510_v63  ;;  %v6585_v62 = vld [vmem:[#allocation5 + $0x840] ss:$16 sps:$4 sm:$0xff]   ;;  %v6588_v63 = vld [vmem:[#allocation5 + $0x848] ss:$16 sps:$4 sm:$0xff]  }
 0x133   :  { %4279 = vmatpush1.bf16.msra.mxu0 %v6505_v0  ;;  %4689 = vmatpush1.bf16.msra.mxu1 %v6508_v1  ;;  %v6593_v0 = vld [vmem:[#allocation5 + $0x864] ss:$16 sps:$4 sm:$0xff]   ;;  %v6596_v1 = vld [vmem:[#allocation5 + $0x86c] ss:$16 sps:$4 sm:$0xff]  }
 0x134   :  { %4280 = vmatprep.subr.bf16.mxu0 %v6513_v2  ;;  %4690 = vmatprep.subr.bf16.mxu1 %v6516_v3  ;;  %v6591_v2 = vld [vmem:[#allocation5 + $0x860] ss:$16 sps:$4 sm:$0xff]   ;;  %v6594_v3 = vld [vmem:[#allocation5 + $0x868] ss:$16 sps:$4 sm:$0xff]  }
 0x137   :  { %4281 = vmatpush1.bf16.msra.mxu0 %v6511_v4  ;;  %4691 = vmatpush1.bf16.msra.mxu1 %v6514_v5  ;;  %v6599_v4 = vld [vmem:[#allocation5 + $0x884] ss:$16 sps:$4 sm:$0xff]   ;;  %v6602_v5 = vld [vmem:[#allocation5 + $0x88c] ss:$16 sps:$4 sm:$0xff]  }
 0x138   :  { %4282 = vmatprep.subr.bf16.mxu0 %v6519_v6  ;;  %4692 = vmatprep.subr.bf16.mxu1 %v6522_v7  ;;  %v6597_v6 = vld [vmem:[#allocation5 + $0x880] ss:$16 sps:$4 sm:$0xff]   ;;  %v6600_v7 = vld [vmem:[#allocation5 + $0x888] ss:$16 sps:$4 sm:$0xff]  }
 0x13b   :  { %4283 = vmatpush1.bf16.msra.mxu0 %v6517_v8  ;;  %4693 = vmatpush1.bf16.msra.mxu1 %v6520_v9  ;;  %v6605_v8 = vld [vmem:[#allocation5 + $0x8a4] ss:$16 sps:$4 sm:$0xff]   ;;  %v6608_v9 = vld [vmem:[#allocation5 + $0x8ac] ss:$16 sps:$4 sm:$0xff]  }
 0x13c   :  { %4284 = vmatprep.subr.bf16.mxu0 %v6525_v10  ;;  %4694 = vmatprep.subr.bf16.mxu1 %v6528_v11  ;;  %v6603_v10 = vld [vmem:[#allocation5 + $0x8a0] ss:$16 sps:$4 sm:$0xff]   ;;  %v6606_v11 = vld [vmem:[#allocation5 + $0x8a8] ss:$16 sps:$4 sm:$0xff]  }
 0x13f   :  { %4285 = vmatpush1.bf16.msra.mxu0 %v6523_v14  ;;  %4695 = vmatpush1.bf16.msra.mxu1 %v6526_v15  ;;  %v6611_v14 = vld [vmem:[#allocation5 + $0x8c4] ss:$16 sps:$4 sm:$0xff]   ;;  %v6614_v15 = vld [vmem:[#allocation5 + $0x8cc] ss:$16 sps:$4 sm:$0xff]  }
 0x140   :  { %4286 = vmatprep.subr.bf16.mxu0 %v6531_v16  ;;  %4696 = vmatprep.subr.bf16.mxu1 %v6534_v17  ;;  %v6609_v16 = vld [vmem:[#allocation5 + $0x8c0] ss:$16 sps:$4 sm:$0xff]   ;;  %v6612_v17 = vld [vmem:[#allocation5 + $0x8c8] ss:$16 sps:$4 sm:$0xff]  }
 0x143   :  { %4287 = vmatpush1.bf16.msra.mxu0 %v6529_v18  ;;  %4697 = vmatpush1.bf16.msra.mxu1 %v6532_v19  ;;  %v6617_v18 = vld [vmem:[#allocation5 + $0x8e4] ss:$16 sps:$4 sm:$0xff]   ;;  %v6620_v19 = vld [vmem:[#allocation5 + $0x8ec] ss:$16 sps:$4 sm:$0xff]  }
 0x144   :  { %4288 = vmatprep.subr.bf16.mxu0 %v6537_v20  ;;  %4698 = vmatprep.subr.bf16.mxu1 %v6540_v21  ;;  %v6615_v20 = vld [vmem:[#allocation5 + $0x8e0] ss:$16 sps:$4 sm:$0xff]   ;;  %v6618_v21 = vld [vmem:[#allocation5 + $0x8e8] ss:$16 sps:$4 sm:$0xff]  }
 0x147   :  { %4289 = vmatpush1.bf16.msra.mxu0 %v6535_v22  ;;  %4699 = vmatpush1.bf16.msra.mxu1 %v6538_v23  ;;  %v6623_v22 = vld [vmem:[#allocation5 + $0x904] ss:$16 sps:$4 sm:$0xff]   ;;  %v6626_v23 = vld [vmem:[#allocation5 + $0x90c] ss:$16 sps:$4 sm:$0xff]  }
 0x148   :  { %4290 = vmatprep.subr.bf16.mxu0 %v6543_v24  ;;  %4700 = vmatprep.subr.bf16.mxu1 %v6546_v25  ;;  %v6621_v24 = vld [vmem:[#allocation5 + $0x900] ss:$16 sps:$4 sm:$0xff]   ;;  %v6624_v25 = vld [vmem:[#allocation5 + $0x908] ss:$16 sps:$4 sm:$0xff]  }
 0x14b   :  { %4291 = vmatpush1.bf16.msra.mxu0 %v6541_v26  ;;  %4701 = vmatpush1.bf16.msra.mxu1 %v6544_v27  ;;  %v6629_v26 = vld [vmem:[#allocation5 + $0x924] ss:$16 sps:$4 sm:$0xff]   ;;  %v6632_v27 = vld [vmem:[#allocation5 + $0x92c] ss:$16 sps:$4 sm:$0xff]  }
 0x14c   :  { %4292 = vmatprep.subr.bf16.mxu0 %v6549_v28  ;;  %4702 = vmatprep.subr.bf16.mxu1 %v6552_v29  ;;  %v6627_v28 = vld [vmem:[#allocation5 + $0x920] ss:$16 sps:$4 sm:$0xff]   ;;  %v6630_v29 = vld [vmem:[#allocation5 + $0x928] ss:$16 sps:$4 sm:$0xff]  }
 0x14f   :  { %4293 = vmatpush1.bf16.msra.mxu0 %v6547_v30  ;;  %4703 = vmatpush1.bf16.msra.mxu1 %v6550_v31  ;;  %v6635_v30 = vld [vmem:[#allocation5 + $0x944] ss:$16 sps:$4 sm:$0xff]   ;;  %v6638_v31 = vld [vmem:[#allocation5 + $0x94c] ss:$16 sps:$4 sm:$0xff]  }
 0x150   :  { %4294 = vmatprep.subr.bf16.mxu0 %v6555_v32  ;;  %4704 = vmatprep.subr.bf16.mxu1 %v6558_v33  ;;  %v6633_v32 = vld [vmem:[#allocation5 + $0x940] ss:$16 sps:$4 sm:$0xff]   ;;  %v6636_v33 = vld [vmem:[#allocation5 + $0x948] ss:$16 sps:$4 sm:$0xff]  }
 0x153   :  { %4295 = vmatpush1.bf16.msra.mxu0 %v6553_v34  ;;  %4705 = vmatpush1.bf16.msra.mxu1 %v6556_v35  ;;  %v6641_v34 = vld [vmem:[#allocation5 + $0x964] ss:$16 sps:$4 sm:$0xff]   ;;  %v6644_v35 = vld [vmem:[#allocation5 + $0x96c] ss:$16 sps:$4 sm:$0xff]  }
 0x154   :  { %4296 = vmatprep.subr.bf16.mxu0 %v6561_v38  ;;  %4706 = vmatprep.subr.bf16.mxu1 %v6564_v39  ;;  %v6639_v38 = vld [vmem:[#allocation5 + $0x960] ss:$16 sps:$4 sm:$0xff]   ;;  %v6642_v39 = vld [vmem:[#allocation5 + $0x968] ss:$16 sps:$4 sm:$0xff]  }
 0x157   :  { %4297 = vmatpush1.bf16.msra.mxu0 %v6559_v42  ;;  %4707 = vmatpush1.bf16.msra.mxu1 %v6562_v43  ;;  %v6645_v42 = vld [vmem:[#allocation5 + $0x980] ss:$16 sps:$4 sm:$0xff]   ;;  %v6648_v43 = vld [vmem:[#allocation5 + $0x988] ss:$16 sps:$4 sm:$0xff]  }
 0x158   :  { %4298 = vmatprep.subr.bf16.mxu0 %v6567_v44  ;;  %4708 = vmatprep.subr.bf16.mxu1 %v6570_v45  ;;  %v6653_v44 = vld [vmem:[#allocation5 + $0x9a4] ss:$16 sps:$4 sm:$0xff]   ;;  %v6656_v45 = vld [vmem:[#allocation5 + $0x9ac] ss:$16 sps:$4 sm:$0xff]  }
 0x15b   :  { %4299 = vmatpush1.bf16.msra.mxu0 %v6565_v37  ;;  %4709 = vmatpush1.bf16.msra.mxu1 %v6568_v49  ;;  %v6654_v37 = vld [vmem:[#allocation5 + $0x9a8] ss:$16 sps:$4 sm:$0xff]   ;;  %v6659_v49 = vld [vmem:[#allocation5 + $0x9c4] ss:$16 sps:$4 sm:$0xff]  }
 0x15c   :  { %4309 = vmatprep.subr.bf16.mxu0 %v6575_v50  ;;  %4719 = vmatprep.subr.bf16.mxu1 %v6578_v51  ;;  %v6662_v50 = vld [vmem:[#allocation5 + $0x9cc] ss:$16 sps:$4 sm:$0xff]  }
 0x15d   :  { %v6769_v51 = vld [vmem:[#allocation3 + $0x14] ss:$40 sps:$4 sm:$0xff]  }
 0x15e   :  { %4301 = vmatmul.mubr.bf16.vlgmr.msra.gmra.mrb[0].mxu0 %v336_v54  ;;  %4711 = vmatmul.mubr.bf16.vlgmr.msra.gmra.mrb[0].mxu1 %v336_v54  ;;  %v6657_v54 = vld [vmem:[#allocation5 + $0x9c0] ss:$16 sps:$4 sm:$0xff]  }
 0x15f   :  { %4310 = vmatpush1.bf16.msra.mxu0 %v6573_v55  ;;  %4720 = vmatpush1.bf16.msra.mxu1 %v6576_v56  ;;  %v6660_v55 = vld [vmem:[#allocation5 + $0x9c8] ss:$16 sps:$4 sm:$0xff]   ;;  %v6665_v56 = vld [vmem:[#allocation5 + $0x9e4] ss:$16 sps:$4 sm:$0xff]  }
 0x160   :  { %4311 = vmatprep.subr.bf16.mxu0 %v6581_v57  ;;  %4721 = vmatprep.subr.bf16.mxu1 %v6584_v12  ;;  %v6668_v57 = vld [vmem:[#allocation5 + $0x9ec] ss:$16 sps:$4 sm:$0xff]   ;;  %v7451_v12 = vrot.slane %v6769_v51, %v7408_v53  ;;  %v6747_v51 = vld [vmem:[#allocation5 + $0xb84] ss:$16 sps:$4 sm:$0xff]  }
 0x161   :  { %4341 = vmatprep.mubr.bf16.mxu0 %v339_v13  ;;  %4751 = vmatprep.mubr.bf16.mxu1 %v339_v13  ;;  %v7454_v13 = vrot.slane %v6770_v52, %v7408_v53  ;;  %v6750_v52 = vld [vmem:[#allocation5 + $0xb8c] ss:$16 sps:$4 sm:$0xff]  }
 0x163   :  { %4312 = vmatpush1.bf16.msra.mxu0 %v6579_v58  ;;  %4722 = vmatpush1.bf16.msra.mxu1 %v6582_v59  ;;  %v234_v58 = vcombine.low %v7441_v47, %v7444_v48  ;;  %v6663_v59 = vld [vmem:[#allocation5 + $0x9e0] ss:$16 sps:$4 sm:$0xff]   ;;  %v6684_v47 = vld [vmem:[#allocation5 + $0xa2c] ss:$16 sps:$4 sm:$0xff]  }
 0x164   :  { %4313 = vmatprep.subr.bf16.mxu0 %v6587_v60  ;;  %4723 = vmatprep.subr.bf16.mxu1 %v6590_v61  ;;  %v6666_v60 = vld [vmem:[#allocation5 + $0x9e8] ss:$16 sps:$4 sm:$0xff]   ;;  %v6675_v61 = vld [vmem:[#allocation5 + $0xa04] ss:$16 sps:$4 sm:$0xff]  }
 0x167   :  { %4314 = vmatpush1.bf16.msra.mxu0 %v6585_v62  ;;  %4724 = vmatpush1.bf16.msra.mxu1 %v6588_v63  ;;  %v6678_v62 = vld [vmem:[#allocation5 + $0xa0c] ss:$16 sps:$4 sm:$0xff]   ;;  %v237_v63 = vcombine.high %v7451_v12, %v7454_v13 }
 0x168   :  { %4315 = vmatprep.subr.bf16.mxu0 %v6593_v0  ;;  %4725 = vmatprep.subr.bf16.mxu1 %v6596_v1  ;;  %v338_v0 = vpack.c.bf16 %v234_v58, %v234_v58  ;;  %v6673_v1 = vld [vmem:[#allocation5 + $0xa00] ss:$16 sps:$4 sm:$0xff]  }
 0x169   :  { %v341_v48 = vpack.c.bf16 %v237_v63, %v237_v63  ;;  %v6751_v58 = vld [vmem:[#allocation5 + $0xba0] ss:$16 sps:$4 sm:$0xff]  }
 0x16a   :  { %v6869_v63 = vld [vmem:[#allocation3 + $0x68] ss:$40 sps:$4 sm:$0xff]  }
 0x16b   :  { %4316 = vmatpush1.bf16.msra.mxu0 %v6591_v2  ;;  %4726 = vmatpush1.bf16.msra.mxu1 %v6594_v3  ;;  %v6676_v2 = vld [vmem:[#allocation5 + $0xa08] ss:$16 sps:$4 sm:$0xff]   ;;  %v6681_v3 = vld [vmem:[#allocation5 + $0xa24] ss:$16 sps:$4 sm:$0xff]  }
 0x16c   :  { %4317 = vmatprep.subr.bf16.mxu0 %v6599_v4  ;;  %4727 = vmatprep.subr.bf16.mxu1 %v6602_v5  ;;  %v6679_v4 = vld [vmem:[#allocation5 + $0xa20] ss:$16 sps:$4 sm:$0xff]   ;;  %v6682_v5 = vld [vmem:[#allocation5 + $0xa28] ss:$16 sps:$4 sm:$0xff]  }
 0x16f   :  { %4318 = vmatpush1.bf16.msra.mxu0 %v6597_v6  ;;  %4728 = vmatpush1.bf16.msra.mxu1 %v6600_v7  ;;  %v6687_v6 = vld [vmem:[#allocation5 + $0xa44] ss:$16 sps:$4 sm:$0xff]   ;;  %v6690_v7 = vld [vmem:[#allocation5 + $0xa4c] ss:$16 sps:$4 sm:$0xff]  }
 0x170   :  { %4319 = vmatprep.subr.bf16.mxu0 %v6605_v8  ;;  %4729 = vmatprep.subr.bf16.mxu1 %v6608_v9  ;;  %v6685_v8 = vld [vmem:[#allocation5 + $0xa40] ss:$16 sps:$4 sm:$0xff]   ;;  %v6688_v9 = vld [vmem:[#allocation5 + $0xa48] ss:$16 sps:$4 sm:$0xff]  }
 0x173   :  { %4320 = vmatpush1.bf16.msra.mxu0 %v6603_v10  ;;  %4730 = vmatpush1.bf16.msra.mxu1 %v6606_v11  ;;  %v6693_v10 = vld [vmem:[#allocation5 + $0xa64] ss:$16 sps:$4 sm:$0xff]   ;;  %v6696_v11 = vld [vmem:[#allocation5 + $0xa6c] ss:$16 sps:$4 sm:$0xff]  }
 0x174   :  { %4321 = vmatprep.subr.bf16.mxu0 %v6611_v14  ;;  %4731 = vmatprep.subr.bf16.mxu1 %v6614_v15  ;;  %v6691_v14 = vld [vmem:[#allocation5 + $0xa60] ss:$16 sps:$4 sm:$0xff]   ;;  %v6694_v15 = vld [vmem:[#allocation5 + $0xa68] ss:$16 sps:$4 sm:$0xff]  }
 0x177   :  { %4322 = vmatpush1.bf16.msra.mxu0 %v6609_v16  ;;  %4732 = vmatpush1.bf16.msra.mxu1 %v6612_v17  ;;  %v6699_v16 = vld [vmem:[#allocation5 + $0xa84] ss:$16 sps:$4 sm:$0xff]   ;;  %v6702_v17 = vld [vmem:[#allocation5 + $0xa8c] ss:$16 sps:$4 sm:$0xff]  }
 0x178   :  { %4323 = vmatprep.subr.bf16.mxu0 %v6617_v18  ;;  %4733 = vmatprep.subr.bf16.mxu1 %v6620_v19  ;;  %v6697_v18 = vld [vmem:[#allocation5 + $0xa80] ss:$16 sps:$4 sm:$0xff]   ;;  %v6700_v19 = vld [vmem:[#allocation5 + $0xa88] ss:$16 sps:$4 sm:$0xff]  }
 0x17b   :  { %4324 = vmatpush1.bf16.msra.mxu0 %v6615_v20  ;;  %4734 = vmatpush1.bf16.msra.mxu1 %v6618_v21  ;;  %v6705_v20 = vld [vmem:[#allocation5 + $0xaa4] ss:$16 sps:$4 sm:$0xff]   ;;  %v6708_v21 = vld [vmem:[#allocation5 + $0xaac] ss:$16 sps:$4 sm:$0xff]  }
 0x17c   :  { %4325 = vmatprep.subr.bf16.mxu0 %v6623_v22  ;;  %4735 = vmatprep.subr.bf16.mxu1 %v6626_v23  ;;  %v6703_v22 = vld [vmem:[#allocation5 + $0xaa0] ss:$16 sps:$4 sm:$0xff]   ;;  %v6706_v23 = vld [vmem:[#allocation5 + $0xaa8] ss:$16 sps:$4 sm:$0xff]  }
 0x17f   :  { %4326 = vmatpush1.bf16.msra.mxu0 %v6621_v24  ;;  %4736 = vmatpush1.bf16.msra.mxu1 %v6624_v25  ;;  %v6711_v24 = vld [vmem:[#allocation5 + $0xac4] ss:$16 sps:$4 sm:$0xff]   ;;  %v6714_v25 = vld [vmem:[#allocation5 + $0xacc] ss:$16 sps:$4 sm:$0xff]  }
 0x180   :  { %4327 = vmatprep.subr.bf16.mxu0 %v6629_v26  ;;  %4737 = vmatprep.subr.bf16.mxu1 %v6632_v27  ;;  %v6709_v26 = vld [vmem:[#allocation5 + $0xac0] ss:$16 sps:$4 sm:$0xff]   ;;  %v6712_v27 = vld [vmem:[#allocation5 + $0xac8] ss:$16 sps:$4 sm:$0xff]  }
 0x183   :  { %4328 = vmatpush1.bf16.msra.mxu0 %v6627_v28  ;;  %4738 = vmatpush1.bf16.msra.mxu1 %v6630_v29  ;;  %v6717_v28 = vld [vmem:[#allocation5 + $0xae4] ss:$16 sps:$4 sm:$0xff]   ;;  %v6720_v29 = vld [vmem:[#allocation5 + $0xaec] ss:$16 sps:$4 sm:$0xff]  }
 0x184   :  { %4329 = vmatprep.subr.bf16.mxu0 %v6635_v30  ;;  %4739 = vmatprep.subr.bf16.mxu1 %v6638_v31  ;;  %v6715_v30 = vld [vmem:[#allocation5 + $0xae0] ss:$16 sps:$4 sm:$0xff]   ;;  %v6718_v31 = vld [vmem:[#allocation5 + $0xae8] ss:$16 sps:$4 sm:$0xff]  }
 0x187   :  { %4330 = vmatpush1.bf16.msra.mxu0 %v6633_v32  ;;  %4740 = vmatpush1.bf16.msra.mxu1 %v6636_v33  ;;  %v6723_v32 = vld [vmem:[#allocation5 + $0xb04] ss:$16 sps:$4 sm:$0xff]   ;;  %v6726_v33 = vld [vmem:[#allocation5 + $0xb0c] ss:$16 sps:$4 sm:$0xff]  }
 0x188   :  { %4331 = vmatprep.subr.bf16.mxu0 %v6641_v34  ;;  %4741 = vmatprep.subr.bf16.mxu1 %v6644_v35  ;;  %v6721_v34 = vld [vmem:[#allocation5 + $0xb00] ss:$16 sps:$4 sm:$0xff]   ;;  %v6724_v35 = vld [vmem:[#allocation5 + $0xb08] ss:$16 sps:$4 sm:$0xff]  }
 0x18b   :  { %4332 = vmatpush1.bf16.msra.mxu0 %v6639_v38  ;;  %4742 = vmatpush1.bf16.msra.mxu1 %v6642_v39  ;;  %v6729_v38 = vld [vmem:[#allocation5 + $0xb24] ss:$16 sps:$4 sm:$0xff]   ;;  %v6732_v39 = vld [vmem:[#allocation5 + $0xb2c] ss:$16 sps:$4 sm:$0xff]  }
 0x18c   :  { %4333 = vmatprep.subr.bf16.mxu0 %v6647_v40  ;;  %4743 = vmatprep.subr.bf16.mxu1 %v6650_v41  ;;  %v6727_v40 = vld [vmem:[#allocation5 + $0xb20] ss:$16 sps:$4 sm:$0xff]   ;;  %v6730_v41 = vld [vmem:[#allocation5 + $0xb28] ss:$16 sps:$4 sm:$0xff]  }
 0x18f   :  { %4334 = vmatpush1.bf16.msra.mxu0 %v6645_v42  ;;  %4744 = vmatpush1.bf16.msra.mxu1 %v6648_v43  ;;  %v6735_v42 = vld [vmem:[#allocation5 + $0xb44] ss:$16 sps:$4 sm:$0xff]   ;;  %v6738_v43 = vld [vmem:[#allocation5 + $0xb4c] ss:$16 sps:$4 sm:$0xff]  }
 0x190   :  { %4335 = vmatprep.subr.bf16.mxu0 %v6653_v44  ;;  %4745 = vmatprep.subr.bf16.mxu1 %v6656_v45  ;;  %v6733_v44 = vld [vmem:[#allocation5 + $0xb40] ss:$16 sps:$4 sm:$0xff]   ;;  %v6736_v45 = vld [vmem:[#allocation5 + $0xb48] ss:$16 sps:$4 sm:$0xff]  }
 0x193   :  { %4336 = vmatpush1.bf16.msra.mxu0 %v6651_v36  ;;  %4746 = vmatpush1.bf16.msra.mxu1 %v6654_v37  ;;  %v6741_v36 = vld [vmem:[#allocation5 + $0xb64] ss:$16 sps:$4 sm:$0xff]   ;;  %v6744_v37 = vld [vmem:[#allocation5 + $0xb6c] ss:$16 sps:$4 sm:$0xff]  }
 0x194   :  { %4337 = vmatprep.subr.bf16.mxu0 %v6659_v49  ;;  %4747 = vmatprep.subr.bf16.mxu1 %v6662_v50  ;;  %v6739_v49 = vld [vmem:[#allocation5 + $0xb60] ss:$16 sps:$4 sm:$0xff]   ;;  %v6742_v50 = vld [vmem:[#allocation5 + $0xb68] ss:$16 sps:$4 sm:$0xff]  }
 0x197   :  { %4338 = vmatpush1.bf16.msra.mxu0 %v6657_v54  ;;  %4748 = vmatpush1.bf16.msra.mxu1 %v6660_v55  ;;  %v6745_v54 = vld [vmem:[#allocation5 + $0xb80] ss:$16 sps:$4 sm:$0xff]   ;;  %v6748_v55 = vld [vmem:[#allocation5 + $0xb88] ss:$16 sps:$4 sm:$0xff]  }
 0x198   :  { %4339 = vmatprep.subr.bf16.mxu0 %v6665_v56  ;;  %4749 = vmatprep.subr.bf16.mxu1 %v6668_v57  ;;  %v6753_v56 = vld [vmem:[#allocation5 + $0xba4] ss:$16 sps:$4 sm:$0xff]   ;;  %v6756_v57 = vld [vmem:[#allocation5 + $0xbac] ss:$16 sps:$4 sm:$0xff]  }
 0x19b   :  { %4340 = vmatpush1.bf16.msra.mxu0 %v6663_v59  ;;  %4750 = vmatpush1.bf16.msra.mxu1 %v6666_v60  ;;  %v6754_v59 = vld [vmem:[#allocation5 + $0xba8] ss:$16 sps:$4 sm:$0xff]   ;;  %v6759_v60 = vld [vmem:[#allocation5 + $0xbc4] ss:$16 sps:$4 sm:$0xff]  }
 0x19c   :  { %4350 = vmatprep.subr.bf16.mxu0 %v6675_v61  ;;  %4760 = vmatprep.subr.bf16.mxu1 %v6678_v62  ;;  %v6762_v61 = vld [vmem:[#allocation5 + $0xbcc] ss:$16 sps:$4 sm:$0xff]   ;;  %v6867_v62 = vld [vmem:[#allocation3 + $0x18] ss:$40 sps:$4 sm:$0xff]  }
 0x19e   :  { %4342 = vmatmul.mubr.bf16.vlgmr.msra.gmra.mrb[0].mxu0 %v338_v0  ;;  %4752 = vmatmul.mubr.bf16.vlgmr.msra.gmra.mrb[0].mxu1 %v338_v0  ;;  %v6757_v0 = vld [vmem:[#allocation5 + $0xbc0] ss:$16 sps:$4 sm:$0xff]  }
 0x19f   :  { %4351 = vmatpush1.bf16.msra.mxu0 %v6673_v1  ;;  %4761 = vmatpush1.bf16.msra.mxu1 %v6676_v2  ;;  %v6760_v1 = vld [vmem:[#allocation5 + $0xbc8] ss:$16 sps:$4 sm:$0xff]   ;;  %v6765_v2 = vld [vmem:[#allocation5 + $0xbe4] ss:$16 sps:$4 sm:$0xff]  }
 0x1a0   :  { %4352 = vmatprep.subr.bf16.mxu0 %v6681_v3  ;;  %4762 = vmatprep.subr.bf16.mxu1 %v6684_v47  ;;  %v6768_v3 = vld [vmem:[#allocation5 + $0xbec] ss:$16 sps:$4 sm:$0xff]   ;;  %v7461_v47 = vrot.slane %v6867_v62, %v7408_v53  ;;  %v6845_v62 = vld [vmem:[#allocation5 + $0xd84] ss:$16 sps:$4 sm:$0xff]  }
 0x1a1   :  { %4382 = vmatprep.mubr.bf16.mxu0 %v341_v48  ;;  %4792 = vmatprep.mubr.bf16.mxu1 %v341_v48  ;;  %v7464_v48 = vrot.slane %v6869_v63, %v7408_v53  ;;  %v6848_v63 = vld [vmem:[#allocation5 + $0xd8c] ss:$16 sps:$4 sm:$0xff]  }
 0x1a3   :  { %4353 = vmatpush1.bf16.msra.mxu0 %v6679_v4  ;;  %4763 = vmatpush1.bf16.msra.mxu1 %v6682_v5  ;;  %v236_v4 = vcombine.low %v7451_v12, %v7454_v13  ;;  %v6763_v5 = vld [vmem:[#allocation5 + $0xbe0] ss:$16 sps:$4 sm:$0xff]   ;;  %v6782_v12 = vld [vmem:[#allocation5 + $0xc2c] ss:$16 sps:$4 sm:$0xff]  }
 0x1a4   :  { %4354 = vmatprep.subr.bf16.mxu0 %v6687_v6  ;;  %4764 = vmatprep.subr.bf16.mxu1 %v6690_v7  ;;  %v6766_v6 = vld [vmem:[#allocation5 + $0xbe8] ss:$16 sps:$4 sm:$0xff]   ;;  %v6773_v7 = vld [vmem:[#allocation5 + $0xc04] ss:$16 sps:$4 sm:$0xff]  }
 0x1a7   :  { %4355 = vmatpush1.bf16.msra.mxu0 %v6685_v8  ;;  %4765 = vmatpush1.bf16.msra.mxu1 %v6688_v9  ;;  %v6776_v8 = vld [vmem:[#allocation5 + $0xc0c] ss:$16 sps:$4 sm:$0xff]   ;;  %v271_v9 = vcombine.high %v7461_v47, %v7464_v48 }
 0x1a8   :  { %4356 = vmatprep.subr.bf16.mxu0 %v6693_v10  ;;  %4766 = vmatprep.subr.bf16.mxu1 %v6696_v11  ;;  %v340_v10 = vpack.c.bf16 %v236_v4, %v236_v4  ;;  %v6771_v11 = vld [vmem:[#allocation5 + $0xc00] ss:$16 sps:$4 sm:$0xff]  }
 0x1a9   :  { %v343_v13 = vpack.c.bf16 %v271_v9, %v271_v9  ;;  %v6849_v4 = vld [vmem:[#allocation5 + $0xda0] ss:$16 sps:$4 sm:$0xff]   ;;  %v6968_v9 = vld [vmem:[#allocation3 + $0x6c] ss:$40 sps:$4 sm:$0xff]  }
 0x1ab   :  { %4357 = vmatpush1.bf16.msra.mxu0 %v6691_v14  ;;  %4767 = vmatpush1.bf16.msra.mxu1 %v6694_v15  ;;  %v6774_v14 = vld [vmem:[#allocation5 + $0xc08] ss:$16 sps:$4 sm:$0xff]   ;;  %v6779_v15 = vld [vmem:[#allocation5 + $0xc24] ss:$16 sps:$4 sm:$0xff]  }
 0x1ac   :  { %4358 = vmatprep.subr.bf16.mxu0 %v6699_v16  ;;  %4768 = vmatprep.subr.bf16.mxu1 %v6702_v17  ;;  %v6777_v16 = vld [vmem:[#allocation5 + $0xc20] ss:$16 sps:$4 sm:$0xff]   ;;  %v6780_v17 = vld [vmem:[#allocation5 + $0xc28] ss:$16 sps:$4 sm:$0xff]  }
 0x1af   :  { %4359 = vmatpush1.bf16.msra.mxu0 %v6697_v18  ;;  %4769 = vmatpush1.bf16.msra.mxu1 %v6700_v19  ;;  %v6785_v18 = vld [vmem:[#allocation5 + $0xc44] ss:$16 sps:$4 sm:$0xff]   ;;  %v6788_v19 = vld [vmem:[#allocation5 + $0xc4c] ss:$16 sps:$4 sm:$0xff]  }
 0x1b0   :  { %4360 = vmatprep.subr.bf16.mxu0 %v6705_v20  ;;  %4770 = vmatprep.subr.bf16.mxu1 %v6708_v21  ;;  %v6783_v20 = vld [vmem:[#allocation5 + $0xc40] ss:$16 sps:$4 sm:$0xff]   ;;  %v6786_v21 = vld [vmem:[#allocation5 + $0xc48] ss:$16 sps:$4 sm:$0xff]  }
 0x1b3   :  { %4361 = vmatpush1.bf16.msra.mxu0 %v6703_v22  ;;  %4771 = vmatpush1.bf16.msra.mxu1 %v6706_v23  ;;  %v6791_v22 = vld [vmem:[#allocation5 + $0xc64] ss:$16 sps:$4 sm:$0xff]   ;;  %v6794_v23 = vld [vmem:[#allocation5 + $0xc6c] ss:$16 sps:$4 sm:$0xff]  }
 0x1b4   :  { %4362 = vmatprep.subr.bf16.mxu0 %v6711_v24  ;;  %4772 = vmatprep.subr.bf16.mxu1 %v6714_v25  ;;  %v6789_v24 = vld [vmem:[#allocation5 + $0xc60] ss:$16 sps:$4 sm:$0xff]   ;;  %v6792_v25 = vld [vmem:[#allocation5 + $0xc68] ss:$16 sps:$4 sm:$0xff]  }
 0x1b7   :  { %4363 = vmatpush1.bf16.msra.mxu0 %v6709_v26  ;;  %4773 = vmatpush1.bf16.msra.mxu1 %v6712_v27  ;;  %v6797_v26 = vld [vmem:[#allocation5 + $0xc84] ss:$16 sps:$4 sm:$0xff]   ;;  %v6800_v27 = vld [vmem:[#allocation5 + $0xc8c] ss:$16 sps:$4 sm:$0xff]  }
 0x1b8   :  { %4364 = vmatprep.subr.bf16.mxu0 %v6717_v28  ;;  %4774 = vmatprep.subr.bf16.mxu1 %v6720_v29  ;;  %v6795_v28 = vld [vmem:[#allocation5 + $0xc80] ss:$16 sps:$4 sm:$0xff]   ;;  %v6798_v29 = vld [vmem:[#allocation5 + $0xc88] ss:$16 sps:$4 sm:$0xff]  }
 0x1bb   :  { %4365 = vmatpush1.bf16.msra.mxu0 %v6715_v30  ;;  %4775 = vmatpush1.bf16.msra.mxu1 %v6718_v31  ;;  %v6803_v30 = vld [vmem:[#allocation5 + $0xca4] ss:$16 sps:$4 sm:$0xff]   ;;  %v6806_v31 = vld [vmem:[#allocation5 + $0xcac] ss:$16 sps:$4 sm:$0xff]  }
 0x1bc   :  { %4366 = vmatprep.subr.bf16.mxu0 %v6723_v32  ;;  %4776 = vmatprep.subr.bf16.mxu1 %v6726_v33  ;;  %v6801_v32 = vld [vmem:[#allocation5 + $0xca0] ss:$16 sps:$4 sm:$0xff]   ;;  %v6804_v33 = vld [vmem:[#allocation5 + $0xca8] ss:$16 sps:$4 sm:$0xff]  }
 0x1bf   :  { %4367 = vmatpush1.bf16.msra.mxu0 %v6721_v34  ;;  %4777 = vmatpush1.bf16.msra.mxu1 %v6724_v35  ;;  %v6809_v34 = vld [vmem:[#allocation5 + $0xcc4] ss:$16 sps:$4 sm:$0xff]   ;;  %v6812_v35 = vld [vmem:[#allocation5 + $0xccc] ss:$16 sps:$4 sm:$0xff]  }
 0x1c0   :  { %4368 = vmatprep.subr.bf16.mxu0 %v6729_v38  ;;  %4778 = vmatprep.subr.bf16.mxu1 %v6732_v39  ;;  %v6807_v38 = vld [vmem:[#allocation5 + $0xcc0] ss:$16 sps:$4 sm:$0xff]   ;;  %v6810_v39 = vld [vmem:[#allocation5 + $0xcc8] ss:$16 sps:$4 sm:$0xff]  }
 0x1c3   :  { %4369 = vmatpush1.bf16.msra.mxu0 %v6727_v40  ;;  %4779 = vmatpush1.bf16.msra.mxu1 %v6730_v41  ;;  %v6815_v40 = vld [vmem:[#allocation5 + $0xce4] ss:$16 sps:$4 sm:$0xff]   ;;  %v6818_v41 = vld [vmem:[#allocation5 + $0xcec] ss:$16 sps:$4 sm:$0xff]  }
 0x1c4   :  { %4370 = vmatprep.subr.bf16.mxu0 %v6735_v42  ;;  %4780 = vmatprep.subr.bf16.mxu1 %v6738_v43  ;;  %v6813_v42 = vld [vmem:[#allocation5 + $0xce0] ss:$16 sps:$4 sm:$0xff]   ;;  %v6816_v43 = vld [vmem:[#allocation5 + $0xce8] ss:$16 sps:$4 sm:$0xff]  }
 0x1c7   :  { %4371 = vmatpush1.bf16.msra.mxu0 %v6733_v44  ;;  %4781 = vmatpush1.bf16.msra.mxu1 %v6736_v45  ;;  %v6821_v44 = vld [vmem:[#allocation5 + $0xd04] ss:$16 sps:$4 sm:$0xff]   ;;  %v6824_v45 = vld [vmem:[#allocation5 + $0xd0c] ss:$16 sps:$4 sm:$0xff]  }
 0x1c8   :  { %4372 = vmatprep.subr.bf16.mxu0 %v6741_v36  ;;  %4782 = vmatprep.subr.bf16.mxu1 %v6744_v37  ;;  %v6819_v36 = vld [vmem:[#allocation5 + $0xd00] ss:$16 sps:$4 sm:$0xff]   ;;  %v6822_v37 = vld [vmem:[#allocation5 + $0xd08] ss:$16 sps:$4 sm:$0xff]  }
 0x1cb   :  { %4373 = vmatpush1.bf16.msra.mxu0 %v6739_v49  ;;  %4783 = vmatpush1.bf16.msra.mxu1 %v6742_v50  ;;  %v6827_v49 = vld [vmem:[#allocation5 + $0xd24] ss:$16 sps:$4 sm:$0xff]   ;;  %v6830_v50 = vld [vmem:[#allocation5 + $0xd2c] ss:$16 sps:$4 sm:$0xff]  }
 0x1cc   :  { %4374 = vmatprep.subr.bf16.mxu0 %v6747_v51  ;;  %4784 = vmatprep.subr.bf16.mxu1 %v6750_v52  ;;  %v6825_v51 = vld [vmem:[#allocation5 + $0xd20] ss:$16 sps:$4 sm:$0xff]   ;;  %v6828_v52 = vld [vmem:[#allocation5 + $0xd28] ss:$16 sps:$4 sm:$0xff]  }
 0x1cf   :  { %4375 = vmatpush1.bf16.msra.mxu0 %v6745_v54  ;;  %4785 = vmatpush1.bf16.msra.mxu1 %v6748_v55  ;;  %v6833_v54 = vld [vmem:[#allocation5 + $0xd44] ss:$16 sps:$4 sm:$0xff]   ;;  %v6836_v55 = vld [vmem:[#allocation5 + $0xd4c] ss:$16 sps:$4 sm:$0xff]  }
 0x1d0   :  { %4376 = vmatprep.subr.bf16.mxu0 %v6753_v56  ;;  %4786 = vmatprep.subr.bf16.mxu1 %v6756_v57  ;;  %v6831_v56 = vld [vmem:[#allocation5 + $0xd40] ss:$16 sps:$4 sm:$0xff]   ;;  %v6834_v57 = vld [vmem:[#allocation5 + $0xd48] ss:$16 sps:$4 sm:$0xff]  }
 0x1d3   :  { %4377 = vmatpush1.bf16.msra.mxu0 %v6751_v58  ;;  %4787 = vmatpush1.bf16.msra.mxu1 %v6754_v59  ;;  %v6839_v58 = vld [vmem:[#allocation5 + $0xd64] ss:$16 sps:$4 sm:$0xff]   ;;  %v6842_v59 = vld [vmem:[#allocation5 + $0xd6c] ss:$16 sps:$4 sm:$0xff]  }
 0x1d4   :  { %4378 = vmatprep.subr.bf16.mxu0 %v6759_v60  ;;  %4788 = vmatprep.subr.bf16.mxu1 %v6762_v61  ;;  %v6837_v60 = vld [vmem:[#allocation5 + $0xd60] ss:$16 sps:$4 sm:$0xff]   ;;  %v6840_v61 = vld [vmem:[#allocation5 + $0xd68] ss:$16 sps:$4 sm:$0xff]  }
 0x1d7   :  { %4379 = vmatpush1.bf16.msra.mxu0 %v6757_v0  ;;  %4789 = vmatpush1.bf16.msra.mxu1 %v6760_v1  ;;  %v6843_v0 = vld [vmem:[#allocation5 + $0xd80] ss:$16 sps:$4 sm:$0xff]   ;;  %v6846_v1 = vld [vmem:[#allocation5 + $0xd88] ss:$16 sps:$4 sm:$0xff]  }
 0x1d8   :  { %4380 = vmatprep.subr.bf16.mxu0 %v6765_v2  ;;  %4790 = vmatprep.subr.bf16.mxu1 %v6768_v3  ;;  %v6851_v2 = vld [vmem:[#allocation5 + $0xda4] ss:$16 sps:$4 sm:$0xff]   ;;  %v6854_v3 = vld [vmem:[#allocation5 + $0xdac] ss:$16 sps:$4 sm:$0xff]  }
 0x1db   :  { %4381 = vmatpush1.bf16.msra.mxu0 %v6763_v5  ;;  %4791 = vmatpush1.bf16.msra.mxu1 %v6766_v6  ;;  %v6852_v5 = vld [vmem:[#allocation5 + $0xda8] ss:$16 sps:$4 sm:$0xff]   ;;  %v6857_v6 = vld [vmem:[#allocation5 + $0xdc4] ss:$16 sps:$4 sm:$0xff]  }
 0x1dc   :  { %4391 = vmatprep.subr.bf16.mxu0 %v6773_v7  ;;  %4801 = vmatprep.subr.bf16.mxu1 %v6776_v8  ;;  %v6860_v7 = vld [vmem:[#allocation5 + $0xdcc] ss:$16 sps:$4 sm:$0xff]  }
 0x1dd   :  { %v6967_v8 = vld [vmem:[#allocation3 + $0x1c] ss:$40 sps:$4 sm:$0xff]  }
 0x1de   :  { %4383 = vmatmul.mubr.bf16.vlgmr.msra.gmra.mrb[0].mxu0 %v340_v10  ;;  %4793 = vmatmul.mubr.bf16.vlgmr.msra.gmra.mrb[0].mxu1 %v340_v10  ;;  %v6855_v10 = vld [vmem:[#allocation5 + $0xdc0] ss:$16 sps:$4 sm:$0xff]  }
 0x1df   :  { %4392 = vmatpush1.bf16.msra.mxu0 %v6771_v11  ;;  %4802 = vmatpush1.bf16.msra.mxu1 %v6774_v14  ;;  %v6858_v11 = vld [vmem:[#allocation5 + $0xdc8] ss:$16 sps:$4 sm:$0xff]   ;;  %v6863_v14 = vld [vmem:[#allocation5 + $0xde4] ss:$16 sps:$4 sm:$0xff]  }
 0x1e0   :  { %4393 = vmatprep.subr.bf16.mxu0 %v6779_v15  ;;  %4803 = vmatprep.subr.bf16.mxu1 %v6782_v12  ;;  %v6866_v15 = vld [vmem:[#allocation5 + $0xdec] ss:$16 sps:$4 sm:$0xff]   ;;  %v7471_v12 = vrot.slane %v6967_v8, %v7408_v53  ;;  %v6945_v8 = vld [vmem:[#allocation5 + $0xf84] ss:$16 sps:$4 sm:$0xff]  }
 0x1e1   :  { %4423 = vmatprep.mubr.bf16.mxu0 %v343_v13  ;;  %4833 = vmatprep.mubr.bf16.mxu1 %v343_v13  ;;  %v7474_v13 = vrot.slane %v6968_v9, %v7408_v53  ;;  %v6948_v9 = vld [vmem:[#allocation5 + $0xf8c] ss:$16 sps:$4 sm:$0xff]  }
 0x1e3   :  { %4394 = vmatpush1.bf16.msra.mxu0 %v6777_v16  ;;  %4804 = vmatpush1.bf16.msra.mxu1 %v6780_v17  ;;  %v270_v16 = vcombine.low %v7461_v47, %v7464_v48  ;;  %v6861_v17 = vld [vmem:[#allocation5 + $0xde0] ss:$16 sps:$4 sm:$0xff]   ;;  %v6882_v47 = vld [vmem:[#allocation5 + $0xe2c] ss:$16 sps:$4 sm:$0xff]  }
 0x1e4   :  { %4395 = vmatprep.subr.bf16.mxu0 %v6785_v18  ;;  %4805 = vmatprep.subr.bf16.mxu1 %v6788_v19  ;;  %v6864_v18 = vld [vmem:[#allocation5 + $0xde8] ss:$16 sps:$4 sm:$0xff]   ;;  %v6873_v19 = vld [vmem:[#allocation5 + $0xe04] ss:$16 sps:$4 sm:$0xff]  }
 0x1e7   :  { %4396 = vmatpush1.bf16.msra.mxu0 %v6783_v20  ;;  %4806 = vmatpush1.bf16.msra.mxu1 %v6786_v21  ;;  %v6876_v20 = vld [vmem:[#allocation5 + $0xe0c] ss:$16 sps:$4 sm:$0xff]   ;;  %v273_v21 = vcombine.high %v7471_v12, %v7474_v13 }
 0x1e8   :  { %4397 = vmatprep.subr.bf16.mxu0 %v6791_v22  ;;  %4807 = vmatprep.subr.bf16.mxu1 %v6794_v23  ;;  %v342_v22 = vpack.c.bf16 %v270_v16, %v270_v16  ;;  %v6871_v23 = vld [vmem:[#allocation5 + $0xe00] ss:$16 sps:$4 sm:$0xff]  }
 0x1e9   :  { %v345_v48 = vpack.c.bf16 %v273_v21, %v273_v21  ;;  %v6949_v16 = vld [vmem:[#allocation5 + $0xfa0] ss:$16 sps:$4 sm:$0xff]  }
 0x1ea   :  { %v7068_v21 = vld [vmem:[#allocation3 + $0x70] ss:$40 sps:$4 sm:$0xff]  }
 0x1eb   :  { %4398 = vmatpush1.bf16.msra.mxu0 %v6789_v24  ;;  %4808 = vmatpush1.bf16.msra.mxu1 %v6792_v25  ;;  %v6874_v24 = vld [vmem:[#allocation5 + $0xe08] ss:$16 sps:$4 sm:$0xff]   ;;  %v6879_v25 = vld [vmem:[#allocation5 + $0xe24] ss:$16 sps:$4 sm:$0xff]  }
 0x1ec   :  { %4399 = vmatprep.subr.bf16.mxu0 %v6797_v26  ;;  %4809 = vmatprep.subr.bf16.mxu1 %v6800_v27  ;;  %v6877_v26 = vld [vmem:[#allocation5 + $0xe20] ss:$16 sps:$4 sm:$0xff]   ;;  %v6880_v27 = vld [vmem:[#allocation5 + $0xe28] ss:$16 sps:$4 sm:$0xff]  }
 0x1ef   :  { %4400 = vmatpush1.bf16.msra.mxu0 %v6795_v28  ;;  %4810 = vmatpush1.bf16.msra.mxu1 %v6798_v29  ;;  %v6885_v28 = vld [vmem:[#allocation5 + $0xe44] ss:$16 sps:$4 sm:$0xff]   ;;  %v6888_v29 = vld [vmem:[#allocation5 + $0xe4c] ss:$16 sps:$4 sm:$0xff]  }
 0x1f0   :  { %4401 = vmatprep.subr.bf16.mxu0 %v6803_v30  ;;  %4811 = vmatprep.subr.bf16.mxu1 %v6806_v31  ;;  %v6883_v30 = vld [vmem:[#allocation5 + $0xe40] ss:$16 sps:$4 sm:$0xff]   ;;  %v6886_v31 = vld [vmem:[#allocation5 + $0xe48] ss:$16 sps:$4 sm:$0xff]  }
 0x1f3   :  { %4402 = vmatpush1.bf16.msra.mxu0 %v6801_v32  ;;  %4812 = vmatpush1.bf16.msra.mxu1 %v6804_v33  ;;  %v6891_v32 = vld [vmem:[#allocation5 + $0xe64] ss:$16 sps:$4 sm:$0xff]   ;;  %v6894_v33 = vld [vmem:[#allocation5 + $0xe6c] ss:$16 sps:$4 sm:$0xff]  }
 0x1f4   :  { %4403 = vmatprep.subr.bf16.mxu0 %v6809_v34  ;;  %4813 = vmatprep.subr.bf16.mxu1 %v6812_v35  ;;  %v6889_v34 = vld [vmem:[#allocation5 + $0xe60] ss:$16 sps:$4 sm:$0xff]   ;;  %v6892_v35 = vld [vmem:[#allocation5 + $0xe68] ss:$16 sps:$4 sm:$0xff]  }
 0x1f7   :  { %4404 = vmatpush1.bf16.msra.mxu0 %v6807_v38  ;;  %4814 = vmatpush1.bf16.msra.mxu1 %v6810_v39  ;;  %v6897_v38 = vld [vmem:[#allocation5 + $0xe84] ss:$16 sps:$4 sm:$0xff]   ;;  %v6900_v39 = vld [vmem:[#allocation5 + $0xe8c] ss:$16 sps:$4 sm:$0xff]  }
 0x1f8   :  { %4405 = vmatprep.subr.bf16.mxu0 %v6815_v40  ;;  %4815 = vmatprep.subr.bf16.mxu1 %v6818_v41  ;;  %v6895_v40 = vld [vmem:[#allocation5 + $0xe80] ss:$16 sps:$4 sm:$0xff]   ;;  %v6898_v41 = vld [vmem:[#allocation5 + $0xe88] ss:$16 sps:$4 sm:$0xff]  }
 0x1fb   :  { %4406 = vmatpush1.bf16.msra.mxu0 %v6813_v42  ;;  %4816 = vmatpush1.bf16.msra.mxu1 %v6816_v43  ;;  %v6903_v42 = vld [vmem:[#allocation5 + $0xea4] ss:$16 sps:$4 sm:$0xff]   ;;  %v6906_v43 = vld [vmem:[#allocation5 + $0xeac] ss:$16 sps:$4 sm:$0xff]  }
 0x1fc   :  { %4407 = vmatprep.subr.bf16.mxu0 %v6821_v44  ;;  %4817 = vmatprep.subr.bf16.mxu1 %v6824_v45  ;;  %v6901_v44 = vld [vmem:[#allocation5 + $0xea0] ss:$16 sps:$4 sm:$0xff]   ;;  %v6904_v45 = vld [vmem:[#allocation5 + $0xea8] ss:$16 sps:$4 sm:$0xff]  }
 0x1ff   :  { %4408 = vmatpush1.bf16.msra.mxu0 %v6819_v36  ;;  %4818 = vmatpush1.bf16.msra.mxu1 %v6822_v37  ;;  %v6909_v36 = vld [vmem:[#allocation5 + $0xec4] ss:$16 sps:$4 sm:$0xff]   ;;  %v6912_v37 = vld [vmem:[#allocation5 + $0xecc] ss:$16 sps:$4 sm:$0xff]  }
 0x200   :  { %4409 = vmatprep.subr.bf16.mxu0 %v6827_v49  ;;  %4819 = vmatprep.subr.bf16.mxu1 %v6830_v50  ;;  %v6907_v49 = vld [vmem:[#allocation5 + $0xec0] ss:$16 sps:$4 sm:$0xff]   ;;  %v6910_v50 = vld [vmem:[#allocation5 + $0xec8] ss:$16 sps:$4 sm:$0xff]  }
 0x203   :  { %4410 = vmatpush1.bf16.msra.mxu0 %v6825_v51  ;;  %4820 = vmatpush1.bf16.msra.mxu1 %v6828_v52  ;;  %v6915_v51 = vld [vmem:[#allocation5 + $0xee4] ss:$16 sps:$4 sm:$0xff]   ;;  %v6918_v52 = vld [vmem:[#allocation5 + $0xeec] ss:$16 sps:$4 sm:$0xff]  }
 0x204   :  { %4411 = vmatprep.subr.bf16.mxu0 %v6833_v54  ;;  %4821 = vmatprep.subr.bf16.mxu1 %v6836_v55  ;;  %v6913_v54 = vld [vmem:[#allocation5 + $0xee0] ss:$16 sps:$4 sm:$0xff]   ;;  %v6916_v55 = vld [vmem:[#allocation5 + $0xee8] ss:$16 sps:$4 sm:$0xff]  }
 0x207   :  { %4412 = vmatpush1.bf16.msra.mxu0 %v6831_v56  ;;  %4822 = vmatpush1.bf16.msra.mxu1 %v6834_v57  ;;  %v6921_v56 = vld [vmem:[#allocation5 + $0xf04] ss:$16 sps:$4 sm:$0xff]   ;;  %v6924_v57 = vld [vmem:[#allocation5 + $0xf0c] ss:$16 sps:$4 sm:$0xff]  }
 0x208   :  { %4413 = vmatprep.subr.bf16.mxu0 %v6839_v58  ;;  %4823 = vmatprep.subr.bf16.mxu1 %v6842_v59  ;;  %v6919_v58 = vld [vmem:[#allocation5 + $0xf00] ss:$16 sps:$4 sm:$0xff]   ;;  %v6922_v59 = vld [vmem:[#allocation5 + $0xf08] ss:$16 sps:$4 sm:$0xff]  }
 0x20b   :  { %4414 = vmatpush1.bf16.msra.mxu0 %v6837_v60  ;;  %4824 = vmatpush1.bf16.msra.mxu1 %v6840_v61  ;;  %v6927_v60 = vld [vmem:[#allocation5 + $0xf24] ss:$16 sps:$4 sm:$0xff]   ;;  %v6930_v61 = vld [vmem:[#allocation5 + $0xf2c] ss:$16 sps:$4 sm:$0xff]  }
 0x20c   :  { %4415 = vmatprep.subr.bf16.mxu0 %v6845_v62  ;;  %4825 = vmatprep.subr.bf16.mxu1 %v6848_v63  ;;  %v6925_v62 = vld [vmem:[#allocation5 + $0xf20] ss:$16 sps:$4 sm:$0xff]   ;;  %v6928_v63 = vld [vmem:[#allocation5 + $0xf28] ss:$16 sps:$4 sm:$0xff]  }
 0x20f   :  { %4416 = vmatpush1.bf16.msra.mxu0 %v6843_v0  ;;  %4826 = vmatpush1.bf16.msra.mxu1 %v6846_v1  ;;  %v6933_v0 = vld [vmem:[#allocation5 + $0xf44] ss:$16 sps:$4 sm:$0xff]   ;;  %v6936_v1 = vld [vmem:[#allocation5 + $0xf4c] ss:$16 sps:$4 sm:$0xff]  }
 0x210   :  { %4417 = vmatprep.subr.bf16.mxu0 %v6851_v2  ;;  %4827 = vmatprep.subr.bf16.mxu1 %v6854_v3  ;;  %v6931_v2 = vld [vmem:[#allocation5 + $0xf40] ss:$16 sps:$4 sm:$0xff]   ;;  %v6934_v3 = vld [vmem:[#allocation5 + $0xf48] ss:$16 sps:$4 sm:$0xff]  }
 0x213   :  { %4418 = vmatpush1.bf16.msra.mxu0 %v6849_v4  ;;  %4828 = vmatpush1.bf16.msra.mxu1 %v6852_v5  ;;  %v6939_v4 = vld [vmem:[#allocation5 + $0xf64] ss:$16 sps:$4 sm:$0xff]   ;;  %v6942_v5 = vld [vmem:[#allocation5 + $0xf6c] ss:$16 sps:$4 sm:$0xff]  }
 0x214   :  { %4419 = vmatprep.subr.bf16.mxu0 %v6857_v6  ;;  %4829 = vmatprep.subr.bf16.mxu1 %v6860_v7  ;;  %v6937_v6 = vld [vmem:[#allocation5 + $0xf60] ss:$16 sps:$4 sm:$0xff]   ;;  %v6940_v7 = vld [vmem:[#allocation5 + $0xf68] ss:$16 sps:$4 sm:$0xff]  }
 0x217   :  { %4420 = vmatpush1.bf16.msra.mxu0 %v6855_v10  ;;  %4830 = vmatpush1.bf16.msra.mxu1 %v6858_v11  ;;  %v6943_v10 = vld [vmem:[#allocation5 + $0xf80] ss:$16 sps:$4 sm:$0xff]   ;;  %v6946_v11 = vld [vmem:[#allocation5 + $0xf88] ss:$16 sps:$4 sm:$0xff]  }
 0x218   :  { %4421 = vmatprep.subr.bf16.mxu0 %v6863_v14  ;;  %4831 = vmatprep.subr.bf16.mxu1 %v6866_v15  ;;  %v6951_v14 = vld [vmem:[#allocation5 + $0xfa4] ss:$16 sps:$4 sm:$0xff]   ;;  %v6954_v15 = vld [vmem:[#allocation5 + $0xfac] ss:$16 sps:$4 sm:$0xff]  }
 0x21b   :  { %4422 = vmatpush1.bf16.msra.mxu0 %v6861_v17  ;;  %4832 = vmatpush1.bf16.msra.mxu1 %v6864_v18  ;;  %v6952_v17 = vld [vmem:[#allocation5 + $0xfa8] ss:$16 sps:$4 sm:$0xff]   ;;  %v6957_v18 = vld [vmem:[#allocation5 + $0xfc4] ss:$16 sps:$4 sm:$0xff]  }
 0x21c   :  { %4432 = vmatprep.subr.bf16.mxu0 %v6873_v19  ;;  %4842 = vmatprep.subr.bf16.mxu1 %v6876_v20  ;;  %v6960_v19 = vld [vmem:[#allocation5 + $0xfcc] ss:$16 sps:$4 sm:$0xff]   ;;  %v7065_v20 = vld [vmem:[#allocation3 + $0x20] ss:$40 sps:$4 sm:$0xff]  }
 0x21e   :  { %4424 = vmatmul.mubr.bf16.vlgmr.msra.gmra.mrb[0].mxu0 %v342_v22  ;;  %4834 = vmatmul.mubr.bf16.vlgmr.msra.gmra.mrb[0].mxu1 %v342_v22  ;;  %v6955_v22 = vld [vmem:[#allocation5 + $0xfc0] ss:$16 sps:$4 sm:$0xff]  }
 0x21f   :  { %4433 = vmatpush1.bf16.msra.mxu0 %v6871_v23  ;;  %4843 = vmatpush1.bf16.msra.mxu1 %v6874_v24  ;;  %v6958_v23 = vld [vmem:[#allocation5 + $0xfc8] ss:$16 sps:$4 sm:$0xff]   ;;  %v6963_v24 = vld [vmem:[#allocation5 + $0xfe4] ss:$16 sps:$4 sm:$0xff]  }
 0x220   :  { %4434 = vmatprep.subr.bf16.mxu0 %v6879_v25  ;;  %4844 = vmatprep.subr.bf16.mxu1 %v6882_v47  ;;  %v6966_v25 = vld [vmem:[#allocation5 + $0xfec] ss:$16 sps:$4 sm:$0xff]   ;;  %v7481_v47 = vrot.slane %v7065_v20, %v7408_v53  ;;  %v7043_v20 = vld [vmem:[#allocation5 + $0x1184] ss:$16 sps:$4 sm:$0xff]  }
 0x221   :  { %4464 = vmatprep.mubr.bf16.mxu0 %v345_v48  ;;  %4874 = vmatprep.mubr.bf16.mxu1 %v345_v48  ;;  %v7484_v48 = vrot.slane %v7068_v21, %v7408_v53  ;;  %v7046_v21 = vld [vmem:[#allocation5 + $0x118c] ss:$16 sps:$4 sm:$0xff]  }
 0x223   :  { %4435 = vmatpush1.bf16.msra.mxu0 %v6877_v26  ;;  %4845 = vmatpush1.bf16.msra.mxu1 %v6880_v27  ;;  %v272_v26 = vcombine.low %v7471_v12, %v7474_v13  ;;  %v6961_v27 = vld [vmem:[#allocation5 + $0xfe0] ss:$16 sps:$4 sm:$0xff]   ;;  %v6980_v12 = vld [vmem:[#allocation5 + $0x102c] ss:$16 sps:$4 sm:$0xff]  }
 0x224   :  { %4436 = vmatprep.subr.bf16.mxu0 %v6885_v28  ;;  %4846 = vmatprep.subr.bf16.mxu1 %v6888_v29  ;;  %v6964_v28 = vld [vmem:[#allocation5 + $0xfe8] ss:$16 sps:$4 sm:$0xff]   ;;  %v6971_v29 = vld [vmem:[#allocation5 + $0x1004] ss:$16 sps:$4 sm:$0xff]  }
 0x227   :  { %4437 = vmatpush1.bf16.msra.mxu0 %v6883_v30  ;;  %4847 = vmatpush1.bf16.msra.mxu1 %v6886_v31  ;;  %v6974_v30 = vld [vmem:[#allocation5 + $0x100c] ss:$16 sps:$4 sm:$0xff]   ;;  %v307_v31 = vcombine.high %v7481_v47, %v7484_v48 }
 0x228   :  { %4438 = vmatprep.subr.bf16.mxu0 %v6891_v32  ;;  %4848 = vmatprep.subr.bf16.mxu1 %v6894_v33  ;;  %v344_v32 = vpack.c.bf16 %v272_v26, %v272_v26  ;;  %v6969_v33 = vld [vmem:[#allocation5 + $0x1000] ss:$16 sps:$4 sm:$0xff]  }
 0x229   :  { %v347_v13 = vpack.c.bf16 %v307_v31, %v307_v31  ;;  %v7047_v26 = vld [vmem:[#allocation5 + $0x11a0] ss:$16 sps:$4 sm:$0xff]   ;;  %v7070_v31 = vld [vmem:[#allocation3 + $0x74] ss:$40 sps:$4 sm:$0xff]  }
 0x22b   :  { %4439 = vmatpush1.bf16.msra.mxu0 %v6889_v34  ;;  %4849 = vmatpush1.bf16.msra.mxu1 %v6892_v35  ;;  %v6972_v34 = vld [vmem:[#allocation5 + $0x1008] ss:$16 sps:$4 sm:$0xff]   ;;  %v6977_v35 = vld [vmem:[#allocation5 + $0x1024] ss:$16 sps:$4 sm:$0xff]  }
 0x22c   :  { %4440 = vmatprep.subr.bf16.mxu0 %v6897_v38  ;;  %4850 = vmatprep.subr.bf16.mxu1 %v6900_v39  ;;  %v6975_v38 = vld [vmem:[#allocation5 + $0x1020] ss:$16 sps:$4 sm:$0xff]   ;;  %v6978_v39 = vld [vmem:[#allocation5 + $0x1028] ss:$16 sps:$4 sm:$0xff]  }
 0x22f   :  { %4441 = vmatpush1.bf16.msra.mxu0 %v6895_v40  ;;  %4851 = vmatpush1.bf16.msra.mxu1 %v6898_v41  ;;  %v6983_v40 = vld [vmem:[#allocation5 + $0x1044] ss:$16 sps:$4 sm:$0xff]   ;;  %v6986_v41 = vld [vmem:[#allocation5 + $0x104c] ss:$16 sps:$4 sm:$0xff]  }
 0x230   :  { %4442 = vmatprep.subr.bf16.mxu0 %v6903_v42  ;;  %4852 = vmatprep.subr.bf16.mxu1 %v6906_v43  ;;  %v6981_v42 = vld [vmem:[#allocation5 + $0x1040] ss:$16 sps:$4 sm:$0xff]   ;;  %v6984_v43 = vld [vmem:[#allocation5 + $0x1048] ss:$16 sps:$4 sm:$0xff]  }
 0x233   :  { %4443 = vmatpush1.bf16.msra.mxu0 %v6901_v44  ;;  %4853 = vmatpush1.bf16.msra.mxu1 %v6904_v45  ;;  %v6989_v44 = vld [vmem:[#allocation5 + $0x1064] ss:$16 sps:$4 sm:$0xff]   ;;  %v6992_v45 = vld [vmem:[#allocation5 + $0x106c] ss:$16 sps:$4 sm:$0xff]  }
 0x234   :  { %4444 = vmatprep.subr.bf16.mxu0 %v6909_v36  ;;  %4854 = vmatprep.subr.bf16.mxu1 %v6912_v37  ;;  %v6987_v36 = vld [vmem:[#allocation5 + $0x1060] ss:$16 sps:$4 sm:$0xff]   ;;  %v6990_v37 = vld [vmem:[#allocation5 + $0x1068] ss:$16 sps:$4 sm:$0xff]  }
 0x237   :  { %4445 = vmatpush1.bf16.msra.mxu0 %v6907_v49  ;;  %4855 = vmatpush1.bf16.msra.mxu1 %v6910_v50  ;;  %v6995_v49 = vld [vmem:[#allocation5 + $0x1084] ss:$16 sps:$4 sm:$0xff]   ;;  %v6998_v50 = vld [vmem:[#allocation5 + $0x108c] ss:$16 sps:$4 sm:$0xff]  }
 0x238   :  { %4446 = vmatprep.subr.bf16.mxu0 %v6915_v51  ;;  %4856 = vmatprep.subr.bf16.mxu1 %v6918_v52  ;;  %v6993_v51 = vld [vmem:[#allocation5 + $0x1080] ss:$16 sps:$4 sm:$0xff]   ;;  %v6996_v52 = vld [vmem:[#allocation5 + $0x1088] ss:$16 sps:$4 sm:$0xff]  }
 0x23b   :  { %4447 = vmatpush1.bf16.msra.mxu0 %v6913_v54  ;;  %4857 = vmatpush1.bf16.msra.mxu1 %v6916_v55  ;;  %v7001_v54 = vld [vmem:[#allocation5 + $0x10a4] ss:$16 sps:$4 sm:$0xff]   ;;  %v7004_v55 = vld [vmem:[#allocation5 + $0x10ac] ss:$16 sps:$4 sm:$0xff]  }
 0x23c   :  { %4448 = vmatprep.subr.bf16.mxu0 %v6921_v56  ;;  %4858 = vmatprep.subr.bf16.mxu1 %v6924_v57  ;;  %v6999_v56 = vld [vmem:[#allocation5 + $0x10a0] ss:$16 sps:$4 sm:$0xff]   ;;  %v7002_v57 = vld [vmem:[#allocation5 + $0x10a8] ss:$16 sps:$4 sm:$0xff]  }
 0x23f   :  { %4449 = vmatpush1.bf16.msra.mxu0 %v6919_v58  ;;  %4859 = vmatpush1.bf16.msra.mxu1 %v6922_v59  ;;  %v7007_v58 = vld [vmem:[#allocation5 + $0x10c4] ss:$16 sps:$4 sm:$0xff]   ;;  %v7010_v59 = vld [vmem:[#allocation5 + $0x10cc] ss:$16 sps:$4 sm:$0xff]  }
 0x240   :  { %4450 = vmatprep.subr.bf16.mxu0 %v6927_v60  ;;  %4860 = vmatprep.subr.bf16.mxu1 %v6930_v61  ;;  %v7005_v60 = vld [vmem:[#allocation5 + $0x10c0] ss:$16 sps:$4 sm:$0xff]   ;;  %v7008_v61 = vld [vmem:[#allocation5 + $0x10c8] ss:$16 sps:$4 sm:$0xff]  }
 0x243   :  { %4451 = vmatpush1.bf16.msra.mxu0 %v6925_v62  ;;  %4861 = vmatpush1.bf16.msra.mxu1 %v6928_v63  ;;  %v7013_v62 = vld [vmem:[#allocation5 + $0x10e4] ss:$16 sps:$4 sm:$0xff]   ;;  %v7016_v63 = vld [vmem:[#allocation5 + $0x10ec] ss:$16 sps:$4 sm:$0xff]  }
 0x244   :  { %4452 = vmatprep.subr.bf16.mxu0 %v6933_v0  ;;  %4862 = vmatprep.subr.bf16.mxu1 %v6936_v1  ;;  %v7011_v0 = vld [vmem:[#allocation5 + $0x10e0] ss:$16 sps:$4 sm:$0xff]   ;;  %v7014_v1 = vld [vmem:[#allocation5 + $0x10e8] ss:$16 sps:$4 sm:$0xff]  }
 0x247   :  { %4453 = vmatpush1.bf16.msra.mxu0 %v6931_v2  ;;  %4863 = vmatpush1.bf16.msra.mxu1 %v6934_v3  ;;  %v7019_v2 = vld [vmem:[#allocation5 + $0x1104] ss:$16 sps:$4 sm:$0xff]   ;;  %v7022_v3 = vld [vmem:[#allocation5 + $0x110c] ss:$16 sps:$4 sm:$0xff]  }
 0x248   :  { %4454 = vmatprep.subr.bf16.mxu0 %v6939_v4  ;;  %4864 = vmatprep.subr.bf16.mxu1 %v6942_v5  ;;  %v7017_v4 = vld [vmem:[#allocation5 + $0x1100] ss:$16 sps:$4 sm:$0xff]   ;;  %v7020_v5 = vld [vmem:[#allocation5 + $0x1108] ss:$16 sps:$4 sm:$0xff]  }
 0x24b   :  { %4455 = vmatpush1.bf16.msra.mxu0 %v6937_v6  ;;  %4865 = vmatpush1.bf16.msra.mxu1 %v6940_v7  ;;  %v7025_v6 = vld [vmem:[#allocation5 + $0x1124] ss:$16 sps:$4 sm:$0xff]   ;;  %v7028_v7 = vld [vmem:[#allocation5 + $0x112c] ss:$16 sps:$4 sm:$0xff]  }
 0x24c   :  { %4456 = vmatprep.subr.bf16.mxu0 %v6945_v8  ;;  %4866 = vmatprep.subr.bf16.mxu1 %v6948_v9  ;;  %v7023_v8 = vld [vmem:[#allocation5 + $0x1120] ss:$16 sps:$4 sm:$0xff]   ;;  %v7026_v9 = vld [vmem:[#allocation5 + $0x1128] ss:$16 sps:$4 sm:$0xff]  }
 0x24f   :  { %4457 = vmatpush1.bf16.msra.mxu0 %v6943_v10  ;;  %4867 = vmatpush1.bf16.msra.mxu1 %v6946_v11  ;;  %v7031_v10 = vld [vmem:[#allocation5 + $0x1144] ss:$16 sps:$4 sm:$0xff]   ;;  %v7034_v11 = vld [vmem:[#allocation5 + $0x114c] ss:$16 sps:$4 sm:$0xff]  }
 0x250   :  { %4458 = vmatprep.subr.bf16.mxu0 %v6951_v14  ;;  %4868 = vmatprep.subr.bf16.mxu1 %v6954_v15  ;;  %v7029_v14 = vld [vmem:[#allocation5 + $0x1140] ss:$16 sps:$4 sm:$0xff]   ;;  %v7032_v15 = vld [vmem:[#allocation5 + $0x1148] ss:$16 sps:$4 sm:$0xff]  }
 0x253   :  { %4459 = vmatpush1.bf16.msra.mxu0 %v6949_v16  ;;  %4869 = vmatpush1.bf16.msra.mxu1 %v6952_v17  ;;  %v7037_v16 = vld [vmem:[#allocation5 + $0x1164] ss:$16 sps:$4 sm:$0xff]   ;;  %v7040_v17 = vld [vmem:[#allocation5 + $0x116c] ss:$16 sps:$4 sm:$0xff]  }
 0x254   :  { %4460 = vmatprep.subr.bf16.mxu0 %v6957_v18  ;;  %4870 = vmatprep.subr.bf16.mxu1 %v6960_v19  ;;  %v7035_v18 = vld [vmem:[#allocation5 + $0x1160] ss:$16 sps:$4 sm:$0xff]   ;;  %v7038_v19 = vld [vmem:[#allocation5 + $0x1168] ss:$16 sps:$4 sm:$0xff]  }
 0x257   :  { %4461 = vmatpush1.bf16.msra.mxu0 %v6955_v22  ;;  %4871 = vmatpush1.bf16.msra.mxu1 %v6958_v23  ;;  %v7041_v22 = vld [vmem:[#allocation5 + $0x1180] ss:$16 sps:$4 sm:$0xff]   ;;  %v7044_v23 = vld [vmem:[#allocation5 + $0x1188] ss:$16 sps:$4 sm:$0xff]  }
 0x258   :  { %4462 = vmatprep.subr.bf16.mxu0 %v6963_v24  ;;  %4872 = vmatprep.subr.bf16.mxu1 %v6966_v25  ;;  %v7049_v24 = vld [vmem:[#allocation5 + $0x11a4] ss:$16 sps:$4 sm:$0xff]   ;;  %v7052_v25 = vld [vmem:[#allocation5 + $0x11ac] ss:$16 sps:$4 sm:$0xff]  }
 0x25b   :  { %4463 = vmatpush1.bf16.msra.mxu0 %v6961_v27  ;;  %4873 = vmatpush1.bf16.msra.mxu1 %v6964_v28  ;;  %v7050_v27 = vld [vmem:[#allocation5 + $0x11a8] ss:$16 sps:$4 sm:$0xff]   ;;  %v7055_v28 = vld [vmem:[#allocation5 + $0x11c4] ss:$16 sps:$4 sm:$0xff]  }
 0x25c   :  { %4473 = vmatprep.subr.bf16.mxu0 %v6971_v29  ;;  %4883 = vmatprep.subr.bf16.mxu1 %v6974_v30  ;;  %v7058_v29 = vld [vmem:[#allocation5 + $0x11cc] ss:$16 sps:$4 sm:$0xff]  }
 0x25d   :  { %v7067_v30 = vld [vmem:[#allocation3 + $0x24] ss:$40 sps:$4 sm:$0xff]  }
 0x25e   :  { %4465 = vmatmul.mubr.bf16.vlgmr.msra.gmra.mrb[0].mxu0 %v344_v32  ;;  %4875 = vmatmul.mubr.bf16.vlgmr.msra.gmra.mrb[0].mxu1 %v344_v32  ;;  %v7053_v32 = vld [vmem:[#allocation5 + $0x11c0] ss:$16 sps:$4 sm:$0xff]  }
 0x25f   :  { %4474 = vmatpush1.bf16.msra.mxu0 %v6969_v33  ;;  %4884 = vmatpush1.bf16.msra.mxu1 %v6972_v34  ;;  %v7056_v33 = vld [vmem:[#allocation5 + $0x11c8] ss:$16 sps:$4 sm:$0xff]   ;;  %v7061_v34 = vld [vmem:[#allocation5 + $0x11e4] ss:$16 sps:$4 sm:$0xff]  }
 0x260   :  { %4475 = vmatprep.subr.bf16.mxu0 %v6977_v35  ;;  %4885 = vmatprep.subr.bf16.mxu1 %v6980_v12  ;;  %v7064_v35 = vld [vmem:[#allocation5 + $0x11ec] ss:$16 sps:$4 sm:$0xff]   ;;  %v7491_v12 = vrot.slane %v7067_v30, %v7408_v53  ;;  %v7140_v30 = vld [vmem:[#allocation5 + $0x1368] ss:$16 sps:$4 sm:$0xff]  }
 0x261   :  { %4505 = vmatprep.mubr.bf16.mxu0 %v347_v13  ;;  %4915 = vmatprep.mubr.bf16.mxu1 %v347_v13  ;;  %v7494_v13 = vrot.slane %v7070_v31, %v7408_v53  ;;  %v7074_v53 = vld [vmem:[#allocation5 + $0x1208] ss:$16 sps:$4 sm:$0xff]  }
 0x263   :  { %4476 = vmatpush1.bf16.msra.mxu0 %v6975_v38  ;;  %4886 = vmatpush1.bf16.msra.mxu1 %v6978_v39  ;;  %v306_v38 = vcombine.low %v7481_v47, %v7484_v48  ;;  %v7059_v39 = vld [vmem:[#allocation5 + $0x11e0] ss:$16 sps:$4 sm:$0xff]   ;;  %v7082_v47 = vld [vmem:[#allocation5 + $0x122c] ss:$16 sps:$4 sm:$0xff]  }
 0x264   :  { %4477 = vmatprep.subr.bf16.mxu0 %v6983_v40  ;;  %4887 = vmatprep.subr.bf16.mxu1 %v6986_v41  ;;  %v7062_v40 = vld [vmem:[#allocation5 + $0x11e8] ss:$16 sps:$4 sm:$0xff]   ;;  %v7073_v41 = vld [vmem:[#allocation5 + $0x1204] ss:$16 sps:$4 sm:$0xff]  }
 0x267   :  { %4478 = vmatpush1.bf16.msra.mxu0 %v6981_v42  ;;  %4888 = vmatpush1.bf16.msra.mxu1 %v6984_v43  ;;  %v7076_v42 = vld [vmem:[#allocation5 + $0x120c] ss:$16 sps:$4 sm:$0xff]   ;;  %v309_v43 = vcombine.high %v7491_v12, %v7494_v13 }
 0x268   :  { %4479 = vmatprep.subr.bf16.mxu0 %v6989_v44  ;;  %4889 = vmatprep.subr.bf16.mxu1 %v6992_v45  ;;  %v346_v44 = vpack.c.bf16 %v306_v38, %v306_v38  ;;  %v7071_v45 = vld [vmem:[#allocation5 + $0x1200] ss:$16 sps:$4 sm:$0xff]  }
 0x269   :  { %v349_v48 = vpack.c.bf16 %v309_v43, %v309_v43  ;;  %v7151_v43 = vld [vmem:[%s7616_s3 + $0x48] sm:$0xff]  }
 0x26b   :  { %4480 = vmatpush1.bf16.msra.mxu0 %v6987_v36  ;;  %4890 = vmatpush1.bf16.msra.mxu1 %v6990_v37  ;;  %v7079_v36 = vld [vmem:[#allocation5 + $0x1224] ss:$16 sps:$4 sm:$0xff]   ;;  %v7077_v37 = vld [vmem:[#allocation5 + $0x1220] ss:$16 sps:$4 sm:$0xff]  }
 0x26c   :  { %4481 = vmatprep.subr.bf16.mxu0 %v6995_v49  ;;  %4891 = vmatprep.subr.bf16.mxu1 %v6998_v50  ;;  %v7080_v49 = vld [vmem:[#allocation5 + $0x1228] ss:$16 sps:$4 sm:$0xff]   ;;  %v7085_v50 = vld [vmem:[#allocation5 + $0x1244] ss:$16 sps:$4 sm:$0xff]  }
 0x26f   :  { %4482 = vmatpush1.bf16.msra.mxu0 %v6993_v51  ;;  %4892 = vmatpush1.bf16.msra.mxu1 %v6996_v52  ;;  %v7088_v51 = vld [vmem:[#allocation5 + $0x124c] ss:$16 sps:$4 sm:$0xff]   ;;  %v7083_v52 = vld [vmem:[#allocation5 + $0x1240] ss:$16 sps:$4 sm:$0xff]  }
 0x270   :  { %4483 = vmatprep.subr.bf16.mxu0 %v7001_v54  ;;  %4893 = vmatprep.subr.bf16.mxu1 %v7004_v55  ;;  %v7086_v54 = vld [vmem:[#allocation5 + $0x1248] ss:$16 sps:$4 sm:$0xff]   ;;  %v7091_v55 = vld [vmem:[#allocation5 + $0x1264] ss:$16 sps:$4 sm:$0xff]  }
 0x273   :  { %4484 = vmatpush1.bf16.msra.mxu0 %v6999_v56  ;;  %4894 = vmatpush1.bf16.msra.mxu1 %v7002_v57  ;;  %v7094_v56 = vld [vmem:[#allocation5 + $0x126c] ss:$16 sps:$4 sm:$0xff]   ;;  %v7089_v57 = vld [vmem:[#allocation5 + $0x1260] ss:$16 sps:$4 sm:$0xff]  }
 0x274   :  { %4485 = vmatprep.subr.bf16.mxu0 %v7007_v58  ;;  %4895 = vmatprep.subr.bf16.mxu1 %v7010_v59  ;;  %v7092_v58 = vld [vmem:[#allocation5 + $0x1268] ss:$16 sps:$4 sm:$0xff]   ;;  %v7097_v59 = vld [vmem:[#allocation5 + $0x1284] ss:$16 sps:$4 sm:$0xff]  }
 0x277   :  { %4486 = vmatpush1.bf16.msra.mxu0 %v7005_v60  ;;  %4896 = vmatpush1.bf16.msra.mxu1 %v7008_v61  ;;  %v7100_v60 = vld [vmem:[#allocation5 + $0x128c] ss:$16 sps:$4 sm:$0xff]   ;;  %v7095_v61 = vld [vmem:[#allocation5 + $0x1280] ss:$16 sps:$4 sm:$0xff]  }
 0x278   :  { %4487 = vmatprep.subr.bf16.mxu0 %v7013_v62  ;;  %4897 = vmatprep.subr.bf16.mxu1 %v7016_v63  ;;  %v7098_v62 = vld [vmem:[#allocation5 + $0x1288] ss:$16 sps:$4 sm:$0xff]   ;;  %v7103_v63 = vld [vmem:[#allocation5 + $0x12a4] ss:$16 sps:$4 sm:$0xff]  }
 0x27b   :  { %4488 = vmatpush1.bf16.msra.mxu0 %v7011_v0  ;;  %4898 = vmatpush1.bf16.msra.mxu1 %v7014_v1  ;;  %v7106_v0 = vld [vmem:[#allocation5 + $0x12ac] ss:$16 sps:$4 sm:$0xff]   ;;  %v7101_v1 = vld [vmem:[#allocation5 + $0x12a0] ss:$16 sps:$4 sm:$0xff]  }
 0x27c   :  { %4489 = vmatprep.subr.bf16.mxu0 %v7019_v2  ;;  %4899 = vmatprep.subr.bf16.mxu1 %v7022_v3  ;;  %v7104_v2 = vld [vmem:[#allocation5 + $0x12a8] ss:$16 sps:$4 sm:$0xff]   ;;  %v7109_v3 = vld [vmem:[#allocation5 + $0x12c4] ss:$16 sps:$4 sm:$0xff]  }
 0x27f   :  { %4490 = vmatpush1.bf16.msra.mxu0 %v7017_v4  ;;  %4900 = vmatpush1.bf16.msra.mxu1 %v7020_v5  ;;  %v7112_v4 = vld [vmem:[#allocation5 + $0x12cc] ss:$16 sps:$4 sm:$0xff]   ;;  %v7107_v5 = vld [vmem:[#allocation5 + $0x12c0] ss:$16 sps:$4 sm:$0xff]  }
 0x280   :  { %4491 = vmatprep.subr.bf16.mxu0 %v7025_v6  ;;  %4901 = vmatprep.subr.bf16.mxu1 %v7028_v7  ;;  %v7110_v6 = vld [vmem:[#allocation5 + $0x12c8] ss:$16 sps:$4 sm:$0xff]   ;;  %v7115_v7 = vld [vmem:[#allocation5 + $0x12e4] ss:$16 sps:$4 sm:$0xff]  }
 0x283   :  { %4492 = vmatpush1.bf16.msra.mxu0 %v7023_v8  ;;  %4902 = vmatpush1.bf16.msra.mxu1 %v7026_v9  ;;  %v7118_v8 = vld [vmem:[#allocation5 + $0x12ec] ss:$16 sps:$4 sm:$0xff]   ;;  %v7113_v9 = vld [vmem:[#allocation5 + $0x12e0] ss:$16 sps:$4 sm:$0xff]  }
 0x284   :  { %4493 = vmatprep.subr.bf16.mxu0 %v7031_v10  ;;  %4903 = vmatprep.subr.bf16.mxu1 %v7034_v11  ;;  %v7116_v10 = vld [vmem:[#allocation5 + $0x12e8] ss:$16 sps:$4 sm:$0xff]   ;;  %v7121_v11 = vld [vmem:[#allocation5 + $0x1304] ss:$16 sps:$4 sm:$0xff]  }
 0x287   :  { %4494 = vmatpush1.bf16.msra.mxu0 %v7029_v14  ;;  %4904 = vmatpush1.bf16.msra.mxu1 %v7032_v15  ;;  %v7124_v14 = vld [vmem:[#allocation5 + $0x130c] ss:$16 sps:$4 sm:$0xff]   ;;  %v7119_v15 = vld [vmem:[#allocation5 + $0x1300] ss:$16 sps:$4 sm:$0xff]  }
 0x288   :  { %4495 = vmatprep.subr.bf16.mxu0 %v7037_v16  ;;  %4905 = vmatprep.subr.bf16.mxu1 %v7040_v17  ;;  %v7122_v16 = vld [vmem:[#allocation5 + $0x1308] ss:$16 sps:$4 sm:$0xff]   ;;  %v7127_v17 = vld [vmem:[#allocation5 + $0x1324] ss:$16 sps:$4 sm:$0xff]  }
 0x28b   :  { %4496 = vmatpush1.bf16.msra.mxu0 %v7035_v18  ;;  %4906 = vmatpush1.bf16.msra.mxu1 %v7038_v19  ;;  %v7130_v18 = vld [vmem:[#allocation5 + $0x132c] ss:$16 sps:$4 sm:$0xff]   ;;  %v7125_v19 = vld [vmem:[#allocation5 + $0x1320] ss:$16 sps:$4 sm:$0xff]  }
 0x28c   :  { %4497 = vmatprep.subr.bf16.mxu0 %v7043_v20  ;;  %4907 = vmatprep.subr.bf16.mxu1 %v7046_v21  ;;  %v7128_v20 = vld [vmem:[#allocation5 + $0x1328] ss:$16 sps:$4 sm:$0xff]   ;;  %v7133_v21 = vld [vmem:[#allocation5 + $0x1344] ss:$16 sps:$4 sm:$0xff]  }
 0x28f   :  { %4498 = vmatpush1.bf16.msra.mxu0 %v7041_v22  ;;  %4908 = vmatpush1.bf16.msra.mxu1 %v7044_v23  ;;  %v7136_v22 = vld [vmem:[#allocation5 + $0x134c] ss:$16 sps:$4 sm:$0xff]   ;;  %v7131_v23 = vld [vmem:[#allocation5 + $0x1340] ss:$16 sps:$4 sm:$0xff]  }
 0x290   :  { %4499 = vmatprep.subr.bf16.mxu0 %v7049_v24  ;;  %4909 = vmatprep.subr.bf16.mxu1 %v7052_v25  ;;  %v7134_v24 = vld [vmem:[#allocation5 + $0x1348] ss:$16 sps:$4 sm:$0xff]   ;;  %v7139_v25 = vld [vmem:[#allocation5 + $0x1364] ss:$16 sps:$4 sm:$0xff]  }
 0x293   :  { %4500 = vmatpush1.bf16.msra.mxu0 %v7047_v26  ;;  %4910 = vmatpush1.bf16.msra.mxu1 %v7050_v27  ;;  %v7142_v26 = vld [vmem:[#allocation5 + $0x136c] ss:$16 sps:$4 sm:$0xff]   ;;  %v974_v27 = vld [vmem:[#allocation5 + $0x1380] sm:$0x33] }
 0x294   :  { %4501 = vmatprep.subr.bf16.mxu0 %v7055_v28  ;;  %4911 = vmatprep.subr.bf16.mxu1 %v7058_v29  ;;  %v975_v28 = vld [vmem:[#allocation5 + $0x1388] sm:$0x33]  ;;  %v7137_v29 = vld [vmem:[#allocation5 + $0x1360] ss:$16 sps:$4 sm:$0xff]   ;;  %v6004_v31 = vcombine.high %v974_v27, %v974_v27 }
 0x297   :  { %4502 = vmatpush1.bf16.msra.mxu0 %v7053_v32  ;;  %4912 = vmatpush1.bf16.msra.mxu1 %v7056_v33  ;;  %v6006_v32 = vcombine.high %v975_v28, %v975_v28  ;;  %v6003_v33 = vcombine.low %v974_v27, %v974_v27 }
 0x298   :  { %4503 = vmatprep.subr.bf16.mxu0 %v7061_v34  ;;  %4913 = vmatprep.subr.bf16.mxu1 %v7064_v35  ;;  %v6005_v34 = vcombine.low %v975_v28, %v975_v28  ;;  %v308_v35 = vcombine.low %v7491_v12, %v7494_v13  ;;  %v7149_v12 = vld [vmem:[%s7616_s3] sm:$0xff]  }
 0x299   :  { %v4134_v38 = vsel %vm4132_vm1, %v6003_v33, 0  ;;  %v7150_v13 = vld [vmem:[%s7616_s3 + $0x80] sm:$0xff]  }
 0x29b   :  { %4504 = vmatpush1.bf16.msra.mxu0 %v7059_v39  ;;  %4914 = vmatpush1.bf16.msra.mxu1 %v7062_v40  ;;  %v4140_v39 = vsel %vm4132_vm1, %v6005_v34, 0  ;;  %v7147_v40 = vld [vmem:[%s7616_s3 + $0x40] sm:$0xff]  }
 0x29c   :  { %4514 = vmatprep.subr.bf16.mxu0 %v7073_v41  ;;  %4924 = vmatprep.subr.bf16.mxu1 %v7076_v42  ;;  %v7148_v41 = vld [vmem:[%s7616_s3 + $0xc0] sm:$0xff]   ;;  %v348_v42 = vpack.c.bf16 %v308_v35, %v308_v35 }
 0x29e   :  { %4506 = vmatmul.mubr.bf16.vlgmr.msra.gmra.mrb[0].mxu0 %v346_v44  ;;  %4916 = vmatmul.mubr.bf16.vlgmr.msra.gmra.mrb[0].mxu1 %v346_v44  ;;  %v7152_v44 = vld [vmem:[%s7616_s3 + $0xc8] sm:$0xff]  }
 0x29f   :  { %4515 = vmatpush1.bf16.msra.mxu0 %v7071_v45  ;;  %4925 = vmatpush1.bf16.msra.mxu1 %v7074_v53  ;;  %v7153_v45 = vld [vmem:[%s7616_s3 + $0x8] sm:$0xff]  }
 0x2a0   :  { %4516 = vmatprep.subr.bf16.mxu0 %v7079_v36  ;;  %4926 = vmatprep.subr.bf16.mxu1 %v7082_v47  ;;  %v7154_v53 = vld [vmem:[%s7616_s3 + $0x88] sm:$0xff]   ;;  %v7155_v36 = vld [vmem:[%s7616_s3 + $0x50] sm:$0xff]  }
 0x2a1   :  { %6008 = vmatprep.mubr.msk.bf16.mxu0 %vm4128_vm0, %v349_v48  ;;  %6010 = vmatprep.mubr.msk.bf16.mxu1 %vm4128_vm0, %v349_v48  ;;  %v7156_v47 = vld [vmem:[%s7616_s3 + $0xd0] sm:$0xff]  }
 0x2a2   :  { %v7157_v48 = vld [vmem:[%s7616_s3 + $0x10] sm:$0xff]  }
 0x2a3   :  { %4517 = vmatpush1.bf16.msra.mxu0 %v7077_v37  ;;  %4927 = vmatpush1.bf16.msra.mxu1 %v7080_v49  ;;  %v7158_v37 = vld [vmem:[%s7616_s3 + $0x90] sm:$0xff]   ;;  %v7159_v49 = vld [vmem:[%s7616_s3 + $0x58] sm:$0xff]  }
 0x2a4   :  { %4518 = vmatprep.subr.bf16.mxu0 %v7085_v50  ;;  %4928 = vmatprep.subr.bf16.mxu1 %v7088_v51  ;;  %v7160_v50 = vld [vmem:[%s7616_s3 + $0xd8] sm:$0xff]  }
 0x2a5   :  { %v7161_v51 = vld [vmem:[%s7616_s3 + $0x18] sm:$0xff]  }
 0x2a7   :  { %4519 = vmatpush1.bf16.msra.mxu0 %v7083_v52  ;;  %4929 = vmatpush1.bf16.msra.mxu1 %v7086_v54  ;;  %v7162_v52 = vld [vmem:[%s7616_s3 + $0x98] sm:$0xff]   ;;  %v7163_v54 = vld [vmem:[%s7616_s3 + $0x60] sm:$0xff]  }
 0x2a8   :  { %4520 = vmatprep.subr.bf16.mxu0 %v7091_v55  ;;  %4930 = vmatprep.subr.bf16.mxu1 %v7094_v56  ;;  %v7164_v55 = vld [vmem:[%s7616_s3 + $0xe0] sm:$0xff]  }
 0x2a9   :  { %v7165_v56 = vld [vmem:[%s7616_s3 + $0x20] sm:$0xff]  }
 0x2ab   :  { %4521 = vmatpush1.bf16.msra.mxu0 %v7089_v57  ;;  %4931 = vmatpush1.bf16.msra.mxu1 %v7092_v58  ;;  %v7166_v57 = vld [vmem:[%s7616_s3 + $0xa0] sm:$0xff]   ;;  %v7167_v58 = vld [vmem:[%s7616_s3 + $0x68] sm:$0xff]  }
 0x2ac   :  { %4522 = vmatprep.subr.bf16.mxu0 %v7097_v59  ;;  %4932 = vmatprep.subr.bf16.mxu1 %v7100_v60  ;;  %v7168_v59 = vld [vmem:[%s7616_s3 + $0xe8] sm:$0xff]  }
 0x2ad   :  { %v7169_v60 = vld [vmem:[%s7616_s3 + $0x28] sm:$0xff]  }
 0x2af   :  { %4523 = vmatpush1.bf16.msra.mxu0 %v7095_v61  ;;  %4933 = vmatpush1.bf16.msra.mxu1 %v7098_v62  ;;  %v7170_v61 = vld [vmem:[%s7616_s3 + $0xa8] sm:$0xff]   ;;  %v7171_v62 = vld [vmem:[%s7616_s3 + $0x70] sm:$0xff]  }
 0x2b0   :  { %4524 = vmatprep.subr.bf16.mxu0 %v7103_v63  ;;  %4934 = vmatprep.subr.bf16.mxu1 %v7106_v0  ;;  %v7172_v63 = vld [vmem:[%s7616_s3 + $0xf0] sm:$0xff]  }
 0x2b1   :  { %v7173_v0 = vld [vmem:[%s7616_s3 + $0x30] sm:$0xff]  }
 0x2b3   :  { %4525 = vmatpush1.bf16.msra.mxu0 %v7101_v1  ;;  %4935 = vmatpush1.bf16.msra.mxu1 %v7104_v2  ;;  %v7174_v1 = vld [vmem:[%s7616_s3 + $0xb0] sm:$0xff]   ;;  %v7175_v2 = vld [vmem:[%s7616_s3 + $0x78] sm:$0xff]  }
 0x2b4   :  { %4526 = vmatprep.subr.bf16.mxu0 %v7109_v3  ;;  %4936 = vmatprep.subr.bf16.mxu1 %v7112_v4  ;;  %v7176_v3 = vld [vmem:[%s7616_s3 + $0xf8] ss:$0 sps:$4 sm:$0x33]  }
 0x2b5   :  { %v7177_v4 = vld [vmem:[%s7616_s3 + $0x38] sm:$0xff]  }
 0x2b7   :  { %4527 = vmatpush1.bf16.msra.mxu0 %v7107_v5  ;;  %4937 = vmatpush1.bf16.msra.mxu1 %v7110_v6  ;;  %v7178_v5 = vld [vmem:[%s7616_s3 + $0xb8] sm:$0xff]   ;;  %v980_v6 = vsub.s32 0, %v7405_v46 }
 0x2b8   :  { %4528 = vmatprep.subr.bf16.mxu0 %v7115_v7  ;;  %4938 = vmatprep.subr.bf16.mxu1 %v7118_v8  ;;  %v988_v7 = vsub.s32 2, %v7405_v46  ;;  %v976_v8 = vld [vmem:[#allocation7] sm:$0xf] }
 0x2bb   :  { %4529 = vmatpush1.bf16.msra.mxu0 %v7113_v9  ;;  %4939 = vmatpush1.bf16.msra.mxu1 %v7116_v10  ;;  %v984_v9 = vsub.s32 1, %v7405_v46  ;;  %v992_v10 = vsub.s32 3, %v7405_v46 }
 0x2bc   :  { %4530 = vmatprep.subr.bf16.mxu0 %v7121_v11  ;;  %4940 = vmatprep.subr.bf16.mxu1 %v7124_v14  ;;  %v981_v11 = vrot.slane %v976_v8, %v980_v6  ;;  %v989_v14 = vrot.slane %v976_v8, %v988_v7 }
 0x2bf   :  { %4531 = vmatpush1.bf16.msra.mxu0 %v7119_v15  ;;  %4941 = vmatpush1.bf16.msra.mxu1 %v7122_v16  ;;  %v985_v15 = vrot.slane %v976_v8, %v984_v9  ;;  %v993_v16 = vrot.slane %v976_v8, %v992_v10 }
 0x2c0   :  { %4532 = vmatprep.subr.bf16.mxu0 %v7127_v17  ;;  %4942 = vmatprep.subr.bf16.mxu1 %v7130_v18 }
 0x2c3   :  { %4533 = vmatpush1.bf16.msra.mxu0 %v7125_v19  ;;  %4943 = vmatpush1.bf16.msra.mxu1 %v7128_v20 }
 0x2c4   :  { %4534 = vmatprep.subr.bf16.mxu0 %v7133_v21  ;;  %4944 = vmatprep.subr.bf16.mxu1 %v7136_v22 }
 0x2c7   :  { %4535 = vmatpush1.bf16.msra.mxu0 %v7131_v23  ;;  %4945 = vmatpush1.bf16.msra.mxu1 %v7134_v24 }
 0x2c8   :  { %4536 = vmatprep.subr.bf16.mxu0 %v7139_v25  ;;  %4946 = vmatprep.subr.bf16.mxu1 %v7142_v26 }
 0x2cb   :  { %4537 = vmatpush1.bf16.msra.mxu0 %v7137_v29  ;;  %4947 = vmatpush1.bf16.msra.mxu1 %v7140_v30 }
 0x2cc   :  { %6007 = vmatprep.subr.msk.bf16.mxu0 %vm4132_vm1, %v6004_v31  ;;  %6009 = vmatprep.subr.msk.bf16.mxu1 %vm4132_vm1, %v6006_v32 }
 0x2cf   :  { %4539 = vmatpush1.bf16.msra.mxu0 %v4134_v38  ;;  %4949 = vmatpush1.bf16.msra.mxu1 %v4140_v39 }
 0x2d0   :  { %6046 = vmatprep.subr.bf16.mxu0 %v7147_v40  ;;  %6068 = vmatprep.subr.bf16.mxu1 %v7148_v41  ;;  %v6011_v40 = vld [vmem:[#allocation8] ss:$0 sm:$0xff] }
 0x2d2   :  { %4547 = vmatmul.mubr.bf16.vlgmr.msra.gmra.mrb[0].mxu0 %v348_v42  ;;  %4957 = vmatmul.mubr.bf16.vlgmr.msra.gmra.mrb[0].mxu1 %v348_v42 }
 0x2d3   :  { %6047 = vmatpush3.bf16.msra.mxu0 %v7149_v12  ;;  %6069 = vmatpush3.bf16.msra.mxu1 %v7150_v13 }
 0x2d4   :  { %6048 = vmatprep.subr.bf16.mxu0 %v7151_v43  ;;  %6070 = vmatprep.subr.bf16.mxu1 %v7152_v44 }
 0x2d7   :  { %6049 = vmatpush3.bf16.msra.mxu0 %v7153_v45  ;;  %6071 = vmatpush3.bf16.msra.mxu1 %v7154_v53 }
 0x2d8   :  { %6050 = vmatprep.subr.bf16.mxu0 %v7155_v36  ;;  %6072 = vmatprep.subr.bf16.mxu1 %v7156_v47 }
 0x2db   :  { %6051 = vmatpush3.bf16.msra.mxu0 %v7157_v48  ;;  %6073 = vmatpush3.bf16.msra.mxu1 %v7158_v37  ;;  %v6045_v48 = vld [vmem:[#allocation10] ss:$0 sm:$0xff] }
 0x2dc   :  { %6052 = vmatprep.subr.bf16.mxu0 %v7159_v49  ;;  %6074 = vmatprep.subr.bf16.mxu1 %v7160_v50 }
 0x2df   :  { %6053 = vmatpush3.bf16.msra.mxu0 %v7161_v51  ;;  %6075 = vmatpush3.bf16.msra.mxu1 %v7162_v52  ;;  %v5333_v51 = vstv %s7619_s6 }
 0x2e0   :  { %6054 = vmatprep.subr.bf16.mxu0 %v7163_v54  ;;  %6076 = vmatprep.subr.bf16.mxu1 %v7164_v55 }
 0x2e3   :  { %6055 = vmatpush3.bf16.msra.mxu0 %v7165_v56  ;;  %6077 = vmatpush3.bf16.msra.mxu1 %v7166_v57 }
 0x2e4   :  { %6056 = vmatprep.subr.bf16.mxu0 %v7167_v58  ;;  %6078 = vmatprep.subr.bf16.mxu1 %v7168_v59 }
 0x2e7   :  { %6057 = vmatpush3.bf16.msra.mxu0 %v7169_v60  ;;  %6079 = vmatpush3.bf16.msra.mxu1 %v7170_v61 }
 0x2e8   :  { %6058 = vmatprep.subr.bf16.mxu0 %v7171_v62  ;;  %6080 = vmatprep.subr.bf16.mxu1 %v7172_v63 }
 0x2eb   :  { %6059 = vmatpush3.bf16.msra.mxu0 %v7173_v0  ;;  %6081 = vmatpush3.bf16.msra.mxu1 %v7174_v1 }
 0x2ec   :  { %6060 = vmatprep.subr.bf16.mxu0 %v7175_v2  ;;  %6166 = vmatprep.subr.msk.bf16.mxu1 %vm4132_vm1, %v7176_v3 }
 0x2ef   :  { %6061 = vmatpush3.bf16.msra.mxu0 %v7177_v4  ;;  %6083 = vmatpush3.bf16.msra.mxu1 %v7178_v5 }
 0x3a5   :  { %v4548_v17 = vpop.f32.mrb[0].mxu0  ;;  %v4958_v18 = vpop.f32.mrb[0].mxu1 }
 0x3a6   :  { %v6090_v19 = vadd.f32 %v4548_v17, %v981_v11  ;;  %v6092_v20 = vadd.f32 %v4958_v18, %v989_v14  ;;  %v4550_v21 = vpop.f32.mrb[1].mxu0  ;;  %v4960_v22 = vpop.f32.mrb[1].mxu1 }
 0x3a7   :  { %v6091_v23 = vadd.f32 %v4550_v21, %v985_v15  ;;  %v6093_v24 = vadd.f32 %v4960_v22, %v993_v16  ;;  %v4552_v25 = vpop.f32.mrb[2].mxu0  ;;  %v4962_v26 = vpop.f32.mrb[2].mxu1 }
 0x3a8   :  { %v4965_v27 = vmax.f32 %v6090_v19, 0.0  ;;  %v4967_v28 = vmax.f32 %v6092_v20, 0.0  ;;  %v4553_v29 = vpop.f32.mrb[3].mxu0  ;;  %v4963_v30 = vpop.f32.mrb[3].mxu1 }
 0x3a9   :  { %v4966_v31 = vmax.f32 %v6091_v23, 0.0  ;;  %v4968_v46 = vmax.f32 %v6093_v24, 0.0 }
 0x3aa   :  { %v4969_v34 = vpack.c.bf16 %v4965_v27, %v4965_v27  ;;  %v4971_v35 = vpack.c.bf16 %v4967_v28, %v4967_v28 }
 0x3ab   :  { %v4970_v32 = vpack.c.bf16 %v4966_v31, %v4966_v31  ;;  %v4972_v33 = vpack.c.bf16 %v4968_v46, %v4968_v46 }
 0x3ad   :  { %5271 = vmatprep.mubr.bf16.mxu0 %v4970_v32  ;;  %6044 = vmatprep.mubr.msk.bf16.mxu1 %vm5232_vm2, %v4972_v33 }
 0x3ae   :  { %5272 = vmatmul.mubr.bf16.vlgmr.msra.gmra.mrb[4].mxu0 %v4969_v34  ;;  %5312 = vmatmul.mubr.bf16.vlgmr.msra.gmra.mrb[4].mxu1 %v4971_v35 }
 0x481   :  { %v6062_v38 = vpop.f32.mrb[4].mxu0  ;;  %v6084_v39 = vpop.f32.mrb[4].mxu1 }
 0x482   :  { %v6063_v41 = vpop.f32.mrb[5].mxu0  ;;  %v6085_v42 = vpop.f32.mrb[5].mxu1 }
 0x483   :  { %v6064_v12 = vadd.f32 %v6063_v41, %v6062_v38  ;;  %v6086_v13 = vadd.f32 %v6085_v42, %v6084_v39  ;;  %v6065_v43 = vpop.f32.mrb[6].mxu0  ;;  %v6087_v44 = vpop.f32.mrb[6].mxu1 }
 0x484   :  { %v6066_v45 = vpop.f32.mrb[7].mxu0  ;;  %v6088_v53 = vpop.f32.mrb[7].mxu1 }
 0x485   :  { %v5274_v36 = vadd.f32 %v6064_v12, %v6011_v40 }
 0x487   :  { %v5314_v47 = vadd.f32 %v6086_v13, %v5274_v36 }
 0x489   :  { %v5319_v37 = vmax.f32 %v5314_v47, 0.0 }
 0x48b   :  { %v5327_v49 = vmul.f32 %v6045_v48, %v5319_v37 }
 0x48d   :  { %v5329_v50 = vsel %vm5328_vm3, %v5327_v49, 0.0 }
 0x48e   :  { %5330 = vadd.xlane.f32.xlu0 %v5329_v50 }
 0x51b   :  { %v5331_v52 = vpop.xlane.xlu0 %5330 }
 0x51c   :  { %v5334_v54 = vadd.f32 %v5333_v51, %v5331_v52 }
 0x51e   :  { %5336 = vst.msk [vmem:[#allocation11] sm:$0xff] %vm5335_vm4, %v5334_v54 }
 0x525   :  { %v5354_v55 = vld [vmem:[#allocation11] sm:$0x3] }
 0x526   :  { %5355 = vst [vmem:[%s7620_s7] sm:$0x3] %v5354_v55 }
 0x527   :  { %5372 = vsyncpa [#allocation4], 1 }
 0x528   :  { %5373 = vsyncpa [#allocation6], 1 }
 0x529   :  { %5374 = vsyncpa [#allocation9], 1 }

</bundles_post_ra>
